<compile_context>
chip_gen: v7x
topology: tpu7x:2x2x1
jax: 0.10.0
libtpu: 0.0.40
codegen_flags: <defaults>
</compile_context>

<pallas_src>
import jax
import jax.numpy as jnp
from jax.experimental import pallas as pl
from jax.experimental.pallas import tpu as pltpu

HIDDEN = 1000        # backbone output features (ImageNet-style 1000-class head)
HIDDEN_PAD = 1024    # padded to a multiple of 128 lanes
OUT = 10             # fc_add output features
TB = 128             # batch tile (grid axis, "parallel")


def model_kernel(x_ref, wn_ref, bn_ref, wf_ref, wfa_ref, bf_ref, add_ref, o_ref):
    # --- backbone: Linear(D_in -> 1024pad) + bias + ReLU ---------------------
    # x_ref / wn_ref are bf16; accumulate in f32 on the MXU.
    h = jnp.dot(x_ref[...], wn_ref[...], preferred_element_type=jnp.float32)
    h = jnp.maximum(h + bn_ref[...], jnp.float32(0.0))      # bias + ReLU in f32
    # nn.Dropout(0.5) is the identity in eval/inference mode.
    # TODO(synk): train-mode stochastic dropout not implemented (would use pltpu.prng_*).

    # --- fc_add over concat([h, add_variable[:,None]], dim=1), fused ----------
    logits = jnp.dot(h.astype(jnp.bfloat16), wf_ref[...],
                     preferred_element_type=jnp.float32)     # [TB, 10]
    logits = logits + add_ref[...] * wfa_ref[...] + bf_ref[...]   # f32 VPU work

    # --- softmax(dim=1) over the (full-extent) 10-wide last dim ---------------
    m = jnp.max(logits, axis=1, keepdims=True)
    e = jnp.exp(logits - m)
    denom = jnp.sum(e, axis=1, keepdims=True)
    o_ref[...] = e * pl.reciprocal(denom, approx=True)


def model_forward(x, add_variable, w_net, b_net, w_fc, b_fc):
    """x: [B, D_in] f32, add_variable: [B] f32. Returns [B, 10] f32."""
    B, d_in = x.shape
    num_tiles = pl.cdiv(B, TB)
    b_pad = num_tiles * TB

    # ---- host-side prep: pad batch, pad hidden to 1024, cast matmul operands ----
    x_p = jnp.pad(x.astype(jnp.float32), ((0, b_pad - B), (0, 0))).astype(jnp.bfloat16)
    add_p = jnp.pad(add_variable.astype(jnp.float32), (0, b_pad - B)).reshape(b_pad, 1)

    wn = jnp.pad(w_net.astype(jnp.float32),
                 ((0, 0), (0, HIDDEN_PAD - HIDDEN))).astype(jnp.bfloat16)       # [d_in, 1024]
    bn = jnp.pad(b_net.astype(jnp.float32), (0, HIDDEN_PAD - HIDDEN)).reshape(1, HIDDEN_PAD)
    wf_main = jnp.pad(w_fc[:HIDDEN, :].astype(jnp.float32),
                      ((0, HIDDEN_PAD - HIDDEN), (0, 0))).astype(jnp.bfloat16)  # [1024, 10]
    wfa = w_fc[HIDDEN:HIDDEN + 1, :].astype(jnp.float32)                        # [1, 10]
    bf = b_fc.reshape(1, OUT).astype(jnp.float32)                               # [1, 10]

    const2d = lambda shape: pl.BlockSpec(shape, lambda i: (0, 0))   # weights stay resident

    out_pad = pl.pallas_call(
        model_kernel,
        out_shape=jax.ShapeDtypeStruct((b_pad, OUT), jnp.float32),
        grid=(num_tiles,),
        in_specs=[
            pl.BlockSpec((TB, d_in), lambda i: (i, 0)),        # x tile (bf16)
            const2d((d_in, HIDDEN_PAD)),                       # w_net (bf16)
            const2d((1, HIDDEN_PAD)),                          # b_net (f32)
            const2d((HIDDEN_PAD, OUT)),                        # w_fc_main (bf16)
            const2d((1, OUT)),                                 # w_fc_add row (f32)
            const2d((1, OUT)),                                 # b_fc (f32)
            pl.BlockSpec((TB, 1), lambda i: (i, 0)),           # add_variable tile
        ],
        out_specs=pl.BlockSpec((TB, OUT), lambda i: (i, 0)),
        compiler_params=pltpu.CompilerParams(
            dimension_semantics=("parallel",)),
    )(x_p, wn, bn, wf_main, wfa, bf, add_p)

    return out_pad[:B]


def reference_forward_f32(x, add_variable, w_net, b_net, w_fc, b_fc):
    h = jnp.maximum(x @ w_net + b_net, 0.0)
    cat = jnp.concatenate([h, add_variable[:, None]], axis=1)
    logits = cat @ w_fc + b_fc
    return jax.nn.softmax(logits, axis=1)


def reference_forward_bf16(x, add_variable, w_net, b_net, w_fc, b_fc):
    # Mirrors the kernel's bf16-operand / f32-accumulate numerics.
    h = jnp.dot(x.astype(jnp.bfloat16), w_net.astype(jnp.bfloat16),
                preferred_element_type=jnp.float32)
    h = jnp.maximum(h + b_net, 0.0)
    logits = jnp.dot(h.astype(jnp.bfloat16), w_fc[:HIDDEN].astype(jnp.bfloat16),
                     preferred_element_type=jnp.float32)
    logits = logits + add_variable[:, None] * w_fc[HIDDEN:] + b_fc
    return jax.nn.softmax(logits, axis=1)


if __name__ == "__main__":
    key = jax.random.PRNGKey(0)
    kx, ka, k1, k2, k3, k4 = jax.random.split(key, 6)

    B, D_IN = 8, 64
    x = jax.random.normal(kx, (B, D_IN), dtype=jnp.float32)
    add_variable = jax.random.normal(ka, (B,), dtype=jnp.float32)

    # deterministic synthetic parameters
    w_net = jax.random.normal(k1, (D_IN, HIDDEN), dtype=jnp.float32) * 0.05
    b_net = jax.random.normal(k2, (HIDDEN,), dtype=jnp.float32) * 0.05
    w_fc = jax.random.normal(k3, (HIDDEN + 1, OUT), dtype=jnp.float32) * 0.05
    b_fc = jax.random.normal(k4, (OUT,), dtype=jnp.float32) * 0.05

    out = model_forward(x, add_variable, w_net, b_net, w_fc, b_fc)
    out = jax.block_until_ready(out)

    ref_f32 = reference_forward_f32(x, add_variable, w_net, b_net, w_fc, b_fc)
    ref_bf16 = reference_forward_bf16(x, add_variable, w_net, b_net, w_fc, b_fc)

    assert out.shape == (B, OUT)
    # Tight check vs. a reference with matching bf16-matmul numerics.
    assert jnp.allclose(out, ref_bf16, atol=5e-3, rtol=5e-3), "mismatch vs bf16 reference"
    # Loose check vs. the true f32 model (bf16 matmul precision budget).
    assert jnp.allclose(out, ref_f32, atol=3e-2, rtol=3e-2), "mismatch vs f32 reference"
    assert jnp.allclose(jnp.sum(out, axis=1), 1.0, atol=1e-2), "softmax rows must sum to ~1"

    print("KERNEL_OK")
</pallas_src>

<mosaic_0001>
module attributes {stable_mosaic.version = 11 : i64} {
  func.func @model_kernel(%arg0: i32, %arg1: memref<128x64xbf16, #tpu.memory_space<vmem>>, %arg2: memref<64x1024xbf16, #tpu.memory_space<vmem>>, %arg3: memref<1x1024xf32, #tpu.memory_space<vmem>>, %arg4: memref<1024x10xbf16, #tpu.memory_space<vmem>>, %arg5: memref<1x10xf32, #tpu.memory_space<vmem>>, %arg6: memref<1x10xf32, #tpu.memory_space<vmem>>, %arg7: memref<128x1xf32, #tpu.memory_space<vmem>>, %arg8: memref<128x10xf32, #tpu.memory_space<vmem>>) attributes {dimension_semantics = [#tpu.dimension_semantics<parallel>], iteration_bounds = array<i64: 1>, scalar_prefetch = 0 : i64, scratch_operands = 0 : i64, tpu.core_type = #tpu.core_type<tc>, window_params = [{transform_indices = @transform_0, window_bounds = array<i64: 128, 64>}, {pipeline_mode = #tpu.pipeline_mode<synchronous>, transform_indices = @transform_1, window_bounds = array<i64: 64, 1024>}, {pipeline_mode = #tpu.pipeline_mode<synchronous>, transform_indices = @transform_2, window_bounds = array<i64: 1, 1024>}, {pipeline_mode = #tpu.pipeline_mode<synchronous>, transform_indices = @transform_3, window_bounds = array<i64: 1024, 10>}, {pipeline_mode = #tpu.pipeline_mode<synchronous>, transform_indices = @transform_4, window_bounds = array<i64: 1, 10>}, {pipeline_mode = #tpu.pipeline_mode<synchronous>, transform_indices = @transform_5, window_bounds = array<i64: 1, 10>}, {transform_indices = @transform_6, window_bounds = array<i64: 128, 1>}, {transform_indices = @transform_7, window_bounds = array<i64: 128, 10>}]} {
    %c0 = arith.constant 0 : index
    %c0_0 = arith.constant 0 : index
    %0 = vector.load %arg1[%c0, %c0_0] : memref<128x64xbf16, #tpu.memory_space<vmem>>, vector<128x64xbf16>
    %c0_1 = arith.constant 0 : index
    %c0_2 = arith.constant 0 : index
    %1 = vector.load %arg2[%c0_1, %c0_2] : memref<64x1024xbf16, #tpu.memory_space<vmem>>, vector<64x1024xbf16>
    %cst = arith.constant dense<0.000000e+00> : vector<128x1024xf32>
    %2 = tpu.matmul %0, %1, %cst {dimension_numbers = #tpu.dot_dimension_numbers<[1], [0], [0], [1], [0, 0, 1, 1], [], []>} : vector<128x64xbf16>, vector<64x1024xbf16>, vector<128x1024xf32> -> vector<128x1024xf32>
    %c0_3 = arith.constant 0 : index
    %c0_4 = arith.constant 0 : index
    %3 = vector.load %arg3[%c0_3, %c0_4] : memref<1x1024xf32, #tpu.memory_space<vmem>>, vector<1x1024xf32>
    %4 = vector.broadcast %3 : vector<1x1024xf32> to vector<128x1024xf32>
    %5 = arith.addf %2, %4 : vector<128x1024xf32>
    %cst_5 = arith.constant 0.000000e+00 : f32
    %6 = vector.broadcast %cst_5 : f32 to vector<128x1024xf32>
    %7 = arith.maximumf %5, %6 : vector<128x1024xf32>
    %8 = arith.truncf %7 : vector<128x1024xf32> to vector<128x1024xbf16>
    %c0_6 = arith.constant 0 : index
    %c0_7 = arith.constant 0 : index
    %9 = vector.load %arg4[%c0_6, %c0_7] : memref<1024x10xbf16, #tpu.memory_space<vmem>>, vector<1024x10xbf16>
    %cst_8 = arith.constant dense<0.000000e+00> : vector<128x10xf32>
    %10 = tpu.matmul %8, %9, %cst_8 {dimension_numbers = #tpu.dot_dimension_numbers<[1], [0], [0], [1], [0, 0, 1, 1], [], []>} : vector<128x1024xbf16>, vector<1024x10xbf16>, vector<128x10xf32> -> vector<128x10xf32>
    %c0_9 = arith.constant 0 : index
    %c0_10 = arith.constant 0 : index
    %11 = vector.load %arg7[%c0_9, %c0_10] : memref<128x1xf32, #tpu.memory_space<vmem>>, vector<128x1xf32>
    %c0_11 = arith.constant 0 : index
    %c0_12 = arith.constant 0 : index
    %12 = vector.load %arg5[%c0_11, %c0_12] : memref<1x10xf32, #tpu.memory_space<vmem>>, vector<1x10xf32>
    %13 = vector.broadcast %11 : vector<128x1xf32> to vector<128x10xf32>
    %14 = vector.broadcast %12 : vector<1x10xf32> to vector<128x10xf32>
    %15 = arith.mulf %13, %14 : vector<128x10xf32>
    %16 = arith.addf %10, %15 : vector<128x10xf32>
    %c0_13 = arith.constant 0 : index
    %c0_14 = arith.constant 0 : index
    %17 = vector.load %arg6[%c0_13, %c0_14] : memref<1x10xf32, #tpu.memory_space<vmem>>, vector<1x10xf32>
    %18 = vector.broadcast %17 : vector<1x10xf32> to vector<128x10xf32>
    %19 = arith.addf %16, %18 : vector<128x10xf32>
    %cst_15 = arith.constant dense<0xFF800000> : vector<128xf32>
    %20 = vector.multi_reduction <maximumf>, %19, %cst_15 [1] : vector<128x10xf32> to vector<128xf32>
    %21 = vector.shape_cast %20 : vector<128xf32> to vector<128x1xf32>
    %22 = vector.broadcast %21 : vector<128x1xf32> to vector<128x10xf32>
    %23 = arith.subf %19, %22 : vector<128x10xf32>
    %24 = math.exp %23 : vector<128x10xf32>
    %cst_16 = arith.constant dense<0.000000e+00> : vector<128xf32>
    %25 = vector.multi_reduction <add>, %24, %cst_16 [1] : vector<128x10xf32> to vector<128xf32>
    %26 = vector.shape_cast %25 : vector<128xf32> to vector<128x1xf32>
    %27 = tpu.reciprocal %26 {approx = true} : vector<128x1xf32> -> vector<128x1xf32>
    %28 = vector.broadcast %27 : vector<128x1xf32> to vector<128x10xf32>
    %29 = arith.mulf %24, %28 : vector<128x10xf32>
    %c0_17 = arith.constant 0 : index
    %c0_18 = arith.constant 0 : index
    %30 = vector.load %arg8[%c0_17, %c0_18] : memref<128x10xf32, #tpu.memory_space<vmem>>, vector<128x10xf32>
    tpu.vector_store %arg8[%c0_17, %c0_18], %29 {strides = array<i32>} : memref<128x10xf32, #tpu.memory_space<vmem>>, vector<128x10xf32>,
    return
  }
  func.func @transform_0(%arg0: i32) -> (i32, i32) {
    %c0_i32 = arith.constant 0 : i32
    %c0_i32_0 = arith.constant 0 : i32
    return %arg0, %c0_i32 : i32, i32
  }
  func.func @transform_1(%arg0: i32) -> (i32, i32) {
    %c0_i32 = arith.constant 0 : i32
    %c0_i32_0 = arith.constant 0 : i32
    %c0_i32_1 = arith.constant 0 : i32
    return %c0_i32, %c0_i32_0 : i32, i32
  }
  func.func @transform_2(%arg0: i32) -> (i32, i32) {
    %c0_i32 = arith.constant 0 : i32
    %c0_i32_0 = arith.constant 0 : i32
    %c0_i32_1 = arith.constant 0 : i32
    return %c0_i32, %c0_i32_0 : i32, i32
  }
  func.func @transform_3(%arg0: i32) -> (i32, i32) {
    %c0_i32 = arith.constant 0 : i32
    %c0_i32_0 = arith.constant 0 : i32
    %c0_i32_1 = arith.constant 0 : i32
    return %c0_i32, %c0_i32_0 : i32, i32
  }
  func.func @transform_4(%arg0: i32) -> (i32, i32) {
    %c0_i32 = arith.constant 0 : i32
    %c0_i32_0 = arith.constant 0 : i32
    %c0_i32_1 = arith.constant 0 : i32
    return %c0_i32, %c0_i32_0 : i32, i32
  }
  func.func @transform_5(%arg0: i32) -> (i32, i32) {
    %c0_i32 = arith.constant 0 : i32
    %c0_i32_0 = arith.constant 0 : i32
    %c0_i32_1 = arith.constant 0 : i32
    return %c0_i32, %c0_i32_0 : i32, i32
  }
  func.func @transform_6(%arg0: i32) -> (i32, i32) {
    %c0_i32 = arith.constant 0 : i32
    %c0_i32_0 = arith.constant 0 : i32
    return %arg0, %c0_i32 : i32, i32
  }
  func.func @transform_7(%arg0: i32) -> (i32, i32) {
    %c0_i32 = arith.constant 0 : i32
    %c0_i32_0 = arith.constant 0 : i32
    return %arg0, %c0_i32 : i32, i32
  }
}

</mosaic_0001>

<bundles_post_ra>
// kernel: tpu_custom_call.1
= control target key start
LH: loop header
LB: loop body
LE: loop exit
PB: predicated region body
PF: predicated region fallthrough
CT: control target
= control target key end

     0   :  { %v2758_v3 = vmov 0   ;;  %vm317_vm0 = vcmask 523264   ;;  %vm2028_vm1 = vcmask 80896   ;;  %s3754_s1 = inlined_call_operand.vmem [shape: bf16[64,1024], index: 1, kind: input, shape index: {}]   ;;  %s3755_s0 = inlined_call_operand.vmem [shape: bf16[128,64], index: 0, kind: input, shape index: {}]   ;;  %s3756_s3 = inlined_call_operand.vmem [shape: bf16[1024,10], index: 3, kind: input, shape index: {}]   ;;  %s3757_s6 = inlined_call_operand.vmem [shape: f32[128,1], index: 6, kind: input, shape index: {}]   ;;  %s3758_s2 = inlined_call_operand.vmem [shape: f32[1,1024], index: 2, kind: input, shape index: {}]   ;;  %s3759_s4 = inlined_call_operand.vmem [shape: f32[1,10], index: 4, kind: input, shape index: {}]   ;;  %s3760_s5 = inlined_call_operand.vmem [shape: f32[1,10], index: 5, kind: input, shape index: {}]   ;;  %s3761_s7 = inlined_call_operand.vmem [shape: f32[128,10], index: 7, kind: output, shape index: {}]  }
   0x1   :  { %v43_v0 = vld [vmem:[%s3754_s1] sm:$0xff]  ;;  %v44_v2 = vld [vmem:[%s3754_s1 + $0x8] sm:$0xff]  ;;  %374 = vmatprep.mubr.bf16.mxu0 %v2758_v3  ;;  %487 = vmatprep.mubr.bf16.mxu1 %v2758_v3  ;;  %v45_v31 = vld [vmem:[%s3754_s1 + $0x10] sm:$0xff] }
   0x2   :  { %v47_v1 = vld [vmem:[%s3754_s1 + $0x20] sm:$0xff]  ;;  %v48_v5 = vld [vmem:[%s3754_s1 + $0x28] sm:$0xff]  ;;  %2620 = vset.pattern.permute.xlu0 %v2758_v3  ;;  %2621 = vset.pattern.permute.xlu1 %v2758_v3  ;;  %v49_v32 = vld [vmem:[%s3754_s1 + $0x30] sm:$0xff] }
   0x3   :  { %v2234_v4 = vcombine.high %v43_v0, %v47_v1  ;;  %v2233_v6 = vcombine.low %v43_v0, %v47_v1  ;;  %v51_v7 = vld [vmem:[%s3754_s1 + $0x40] sm:$0xff]  ;;  %v2236_v9 = vcombine.high %v44_v2, %v48_v5  ;;  %v2235_v10 = vcombine.low %v44_v2, %v48_v5  ;;  %v52_v12 = vld [vmem:[%s3754_s1 + $0x48] sm:$0xff]  ;;  %v46_v33 = vld [vmem:[%s3754_s1 + $0x18] sm:$0xff] }
   0x4   :  { %v55_v8 = vld [vmem:[%s3754_s1 + $0x60] sm:$0xff]  ;;  %v56_v13 = vld [vmem:[%s3754_s1 + $0x68] sm:$0xff]  ;;  %v50_v34 = vld [vmem:[%s3754_s1 + $0x38] sm:$0xff]  ;;  %v2238_v38 = vcombine.high %v45_v31, %v49_v32  ;;  %v2237_v42 = vcombine.low %v45_v31, %v49_v32 }
   0x5   :  { %v2242_v11 = vcombine.high %v51_v7, %v55_v8  ;;  %v59_v14 = vld [vmem:[%s3754_s1 + $0x80] sm:$0xff]  ;;  %342 = vmatprep.subr.bf16.mxu0 %v2234_v4  ;;  %v2244_v15 = vcombine.high %v52_v12, %v56_v13  ;;  %v60_v17 = vld [vmem:[%s3754_s1 + $0x88] sm:$0xff]  ;;  %455 = vmatprep.subr.bf16.mxu1 %v2236_v9  ;;  %v2241_v19 = vcombine.low %v51_v7, %v55_v8  ;;  %v53_v40 = vld [vmem:[%s3754_s1 + $0x50] sm:$0xff] }
   0x6   :  { %v63_v16 = vld [vmem:[%s3754_s1 + $0xa0] sm:$0xff]  ;;  %v64_v18 = vld [vmem:[%s3754_s1 + $0xa8] sm:$0xff]  ;;  %343 = vmatpush1.bf16.msra.mxu0 %v2233_v6  ;;  %456 = vmatpush1.bf16.msra.mxu1 %v2235_v10  ;;  %v2243_v20 = vcombine.low %v52_v12, %v56_v13  ;;  %v2240_v39 = vcombine.high %v46_v33, %v50_v34  ;;  %v57_v41 = vld [vmem:[%s3754_s1 + $0x70] sm:$0xff]  ;;  %v2239_v45 = vcombine.low %v46_v33, %v50_v34 }
   0x7   :  { %344 = vmatprep.subr.bf16.mxu0 %v2242_v11  ;;  %v2250_v21 = vcombine.high %v59_v14, %v63_v16  ;;  %457 = vmatprep.subr.bf16.mxu1 %v2244_v15  ;;  %v2252_v22 = vcombine.high %v60_v17, %v64_v18  ;;  %v67_v23 = vld [vmem:[%s3754_s1 + $0xc0] sm:$0xff]  ;;  %v68_v25 = vld [vmem:[%s3754_s1 + $0xc8] sm:$0xff]  ;;  %v2249_v27 = vcombine.low %v59_v14, %v63_v16  ;;  %v54_v43 = vld [vmem:[%s3754_s1 + $0x58] sm:$0xff] }
   0x8   :  { %v71_v24 = vld [vmem:[%s3754_s1 + $0xe0] sm:$0xff]  ;;  %v72_v26 = vld [vmem:[%s3754_s1 + $0xe8] sm:$0xff]  ;;  %v2251_v28 = vcombine.low %v60_v17, %v64_v18  ;;  %v58_v44 = vld [vmem:[%s3754_s1 + $0x78] sm:$0xff]  ;;  %v2246_v48 = vcombine.high %v53_v40, %v57_v41  ;;  %v2245_v52 = vcombine.low %v53_v40, %v57_v41 }
   0x9   :  { %v2258_v29 = vcombine.high %v67_v23, %v71_v24  ;;  %v2260_v30 = vcombine.high %v68_v25, %v72_v26  ;;  %v2257_v35 = vcombine.low %v67_v23, %v71_v24  ;;  %v2259_v36 = vcombine.low %v68_v25, %v72_v26  ;;  %v2866_v37 = vld [vmem:[%s3755_s0] sm:$0xff]   ;;  %v61_v46 = vld [vmem:[%s3754_s1 + $0x90] sm:$0xff]  ;;  %v62_v49 = vld [vmem:[%s3754_s1 + $0x98] sm:$0xff] }
   0xa   :  { %345 = vmatpush1.bf16.msra.mxu0 %v2241_v19  ;;  %458 = vmatpush1.bf16.msra.mxu1 %v2243_v20  ;;  %v65_v47 = vld [vmem:[%s3754_s1 + $0xb0] sm:$0xff]  ;;  %v2248_v50 = vcombine.high %v54_v43, %v58_v44  ;;  %v66_v51 = vld [vmem:[%s3754_s1 + $0xb8] sm:$0xff]  ;;  %v2900_v53 = vld [vmem:[%s3755_s0 + $0x8] sm:$0xff]   ;;  %v2247_v54 = vcombine.low %v54_v43, %v58_v44 }
   0xb   :  { %346 = vmatprep.subr.bf16.mxu0 %v2250_v21  ;;  %459 = vmatprep.subr.bf16.mxu1 %v2252_v22  ;;  %v2254_v55 = vcombine.high %v61_v46, %v65_v47  ;;  %v69_v56 = vld [vmem:[%s3754_s1 + $0xd0] sm:$0xff]  ;;  %v2256_v57 = vcombine.high %v62_v49, %v66_v51  ;;  %v70_v59 = vld [vmem:[%s3754_s1 + $0xd8] sm:$0xff]  ;;  %v2253_v61 = vcombine.low %v61_v46, %v65_v47  ;;  %v2630_v5 = vld [vmem:[%s3756_s3 + $0x40] sm:$0xff]  }
   0xc   :  { %v73_v58 = vld [vmem:[%s3754_s1 + $0xf0] sm:$0xff]  ;;  %v74_v60 = vld [vmem:[%s3754_s1 + $0xf8] sm:$0xff]  ;;  %v2255_v62 = vcombine.low %v62_v49, %v66_v51  ;;  %v2632_v6 = vld [vmem:[%s3756_s3 + $0xc0] sm:$0xff]  }
   0xd   :  { %v2262_v63 = vcombine.high %v69_v56, %v73_v58  ;;  %v2264_v0 = vcombine.high %v70_v59, %v74_v60  ;;  %v2924_v1 = vld [vmem:[%s3755_s0 + $0x10] sm:$0xff]   ;;  %v2261_v2 = vcombine.low %v69_v56, %v73_v58  ;;  %v2263_v4 = vcombine.low %v70_v59, %v74_v60  ;;  %v2941_v7 = vld [vmem:[%s3755_s0 + $0x18] sm:$0xff]   ;;  %v2952_v8 = vld [vmem:[%s3755_s0 + $0x20] sm:$0xff]  }
   0xe   :  { %347 = vmatpush1.bf16.msra.mxu0 %v2249_v27  ;;  %460 = vmatpush1.bf16.msra.mxu1 %v2251_v28  ;;  %v2963_v9 = vld [vmem:[%s3755_s0 + $0x28] sm:$0xff]   ;;  %v2974_v10 = vld [vmem:[%s3755_s0 + $0x30] sm:$0xff]   ;;  %v2985_v11 = vld [vmem:[%s3755_s0 + $0x38] sm:$0xff]  }
   0xf   :  { %348 = vmatprep.subr.bf16.mxu0 %v2258_v29  ;;  %461 = vmatprep.subr.bf16.mxu1 %v2260_v30  ;;  %v2631_v12 = vld [vmem:[%s3756_s3] sm:$0xff]   ;;  %v2634_v14 = vld [vmem:[%s3756_s3 + $0x48] sm:$0xff]   ;;  %v2638_v18 = vld [vmem:[%s3756_s3 + $0x50] sm:$0xff]  }
  0x10   :  { %v2633_v13 = vld [vmem:[%s3756_s3 + $0x80] sm:$0xff]   ;;  %v2636_v15 = vld [vmem:[%s3756_s3 + $0xc8] sm:$0xff]   ;;  %v2640_v19 = vld [vmem:[%s3756_s3 + $0xd0] sm:$0xff]  }
  0x11   :  { %v2635_v16 = vld [vmem:[%s3756_s3 + $0x8] sm:$0xff]   ;;  %v2639_v20 = vld [vmem:[%s3756_s3 + $0x10] sm:$0xff]   ;;  %v2642_v22 = vld [vmem:[%s3756_s3 + $0x58] sm:$0xff]  }
  0x12   :  { %349 = vmatpush1.bf16.msra.mxu0 %v2257_v35  ;;  %462 = vmatpush1.bf16.msra.mxu1 %v2259_v36  ;;  %v2637_v17 = vld [vmem:[%s3756_s3 + $0x88] sm:$0xff]   ;;  %v2641_v21 = vld [vmem:[%s3756_s3 + $0x90] sm:$0xff]   ;;  %v2644_v23 = vld [vmem:[%s3756_s3 + $0xd8] sm:$0xff]  }
  0x13   :  { %568 = vmatprep.subr.bf16.mxu0 %v2238_v38  ;;  %681 = vmatprep.subr.bf16.mxu1 %v2240_v39  ;;  %v2643_v24 = vld [vmem:[%s3756_s3 + $0x18] sm:$0xff]   ;;  %v2646_v26 = vld [vmem:[%s3756_s3 + $0x60] sm:$0xff]   ;;  %v2650_v30 = vld [vmem:[%s3756_s3 + $0x68] sm:$0xff]  }
  0x14   :  { %v2645_v25 = vld [vmem:[%s3756_s3 + $0x98] sm:$0xff]   ;;  %v2648_v27 = vld [vmem:[%s3756_s3 + $0xe0] sm:$0xff]   ;;  %v2652_v31 = vld [vmem:[%s3756_s3 + $0xe8] sm:$0xff]  }
  0x15   :  { %2265 = vmatmul.mubr.msk.bf16.vlgmr.msra.gmra.mrb[0].mxu0 %vm317_vm0, %v2866_v37  ;;  %2273 = vmatmul.mubr.msk.bf16.vlgmr.msra.gmra.mrb[0].mxu1 %vm317_vm0, %v2866_v37  ;;  %v2647_v28 = vld [vmem:[%s3756_s3 + $0x20] sm:$0xff]   ;;  %v2651_v32 = vld [vmem:[%s3756_s3 + $0x28] sm:$0xff]   ;;  %v2654_v34 = vld [vmem:[%s3756_s3 + $0x70] sm:$0xff]  }
  0x16   :  { %569 = vmatpush1.bf16.msra.mxu0 %v2237_v42  ;;  %682 = vmatpush1.bf16.msra.mxu1 %v2239_v45  ;;  %v2649_v29 = vld [vmem:[%s3756_s3 + $0xa0] sm:$0xff]   ;;  %v2653_v33 = vld [vmem:[%s3756_s3 + $0xa8] sm:$0xff]   ;;  %v2656_v35 = vld [vmem:[%s3756_s3 + $0xf0] sm:$0xff]  }
  0x17   :  { %384 = vmatprep.mubr.bf16.mxu0 %v2758_v3  ;;  %497 = vmatprep.mubr.bf16.mxu1 %v2758_v3  ;;  %v2655_v36 = vld [vmem:[%s3756_s3 + $0x30] sm:$0xff]   ;;  %v2658_v38 = vld [vmem:[%s3756_s3 + $0x78] sm:$0xff]   ;;  %v2662_v42 = vld [vmem:[%s3756_s3 + $0x140] sm:$0xff]  }
  0x18   :  { %570 = vmatprep.subr.bf16.mxu0 %v2246_v48  ;;  %683 = vmatprep.subr.bf16.mxu1 %v2248_v50  ;;  %v2660_v39 = vld [vmem:[%s3756_s3 + $0xf8] sm:$0xff]   ;;  %v2664_v43 = vld [vmem:[%s3756_s3 + $0x1c0] sm:$0xff]   ;;  %v1115_v45 = vld [vmem:[%s3757_s6 + $0x8] sm:$0xff]  ;;  %v77_v48 = vlaneseq }
  0x19   :  { %v2659_v40 = vld [vmem:[%s3756_s3 + $0x38] sm:$0xff]   ;;  %v1114_v44 = vld [vmem:[%s3757_s6] sm:$0xff]  ;;  %v1119_v49 = vld [vmem:[%s3757_s6 + $0x28] sm:$0xff] }
  0x1a   :  { %571 = vmatpush1.bf16.msra.mxu0 %v2245_v52  ;;  %684 = vmatpush1.bf16.msra.mxu1 %v2247_v54  ;;  %v2661_v41 = vld [vmem:[%s3756_s3 + $0xb8] sm:$0xff]   ;;  %v1118_v47 = vld [vmem:[%s3757_s6 + $0x20] sm:$0xff]  ;;  %v3153_v50 = vshrl.u32 %v77_v48, 7  ;;  %v1120_v51 = vld [vmem:[%s3757_s6 + $0x30] sm:$0xff] }
  0x1b   :  { %572 = vmatprep.subr.bf16.mxu0 %v2254_v55  ;;  %685 = vmatprep.subr.bf16.mxu1 %v2256_v57  ;;  %v1117_v46 = vld [vmem:[%s3757_s6 + $0x18] sm:$0xff]  ;;  %v1128_v48 = vld [vmem:[%s3757_s6 + $0x70] sm:$0xff] }
  0x1c   :  { %1133 = vperm.xlu0 %2620, %v1114_v44   ;;  %v79_v52 = vsub.s32 0, %v3153_v50  ;;  %v87_v54 = vsub.s32 2, %v3153_v50  ;;  %v83_v55 = vsub.s32 1, %v3153_v50  ;;  %v1121_v56 = vld [vmem:[%s3757_s6 + $0x38] sm:$0xff]  ;;  %v91_v57 = vsub.s32 3, %v3153_v50  ;;  %v2668_v44 = vld [vmem:[%s3756_s3 + $0x1c8] sm:$0xff]  }
  0x1d   :  { %2266 = vmatmul.mubr.msk.bf16.gmra.mrb[4].mxu0 %vm317_vm0, %v2900_v53  ;;  %2274 = vmatmul.mubr.msk.bf16.gmra.mrb[4].mxu1 %vm317_vm0, %v2900_v53 }
  0x1e   :  { %394 = vmatprep.mubr.bf16.mxu0 %v2758_v3  ;;  %507 = vmatprep.mubr.bf16.mxu1 %v2758_v3 }
  0x1f   :  { %573 = vmatpush1.bf16.msra.mxu0 %v2253_v61  ;;  %686 = vmatpush1.bf16.msra.mxu1 %v2255_v62 }
  0x20   :  { %574 = vmatprep.subr.bf16.mxu0 %v2262_v63  ;;  %687 = vmatprep.subr.bf16.mxu1 %v2264_v0  ;;  %v1122_v63 = vld [vmem:[%s3757_s6 + $0x40] sm:$0xff] }
  0x21   :  { %1138 = vperm.xlu0 %2620, %v1115_v45  }
  0x23   :  { %575 = vmatpush1.bf16.msra.mxu0 %v2261_v2  ;;  %688 = vmatpush1.bf16.msra.mxu1 %v2263_v4  ;;  %v1123_v4 = vld [vmem:[%s3757_s6 + $0x48] sm:$0xff] }
  0x24   :  { %2363 = vmatprep.subr.bf16.mxu0 %v2630_v5  ;;  %2427 = vmatprep.subr.bf16.mxu1 %v2632_v6 }
  0x25   :  { %2267 = vmatmul.mubr.msk.bf16.gmra.mrb[8].mxu0 %vm317_vm0, %v2924_v1  ;;  %2275 = vmatmul.mubr.msk.bf16.gmra.mrb[8].mxu1 %vm317_vm0, %v2924_v1 }
  0x26   :  { %404 = vmatprep.mubr.bf16.mxu0 %v2758_v3  ;;  %517 = vmatprep.mubr.bf16.mxu1 %v2758_v3 }
  0x27   :  { %1153 = vperm.xlu0 %2620, %v1118_v47  }
  0x2b   :  { %1163 = vperm.xlu0 %2620, %v1120_v51  }
  0x2d   :  { %2268 = vmatmul.mubr.msk.bf16.gmra.mrb[12].mxu0 %vm317_vm0, %v2941_v7  ;;  %2276 = vmatmul.mubr.msk.bf16.gmra.mrb[12].mxu1 %vm317_vm0, %v2941_v7 }
  0x2e   :  { %414 = vmatprep.mubr.bf16.mxu0 %v2758_v3  ;;  %527 = vmatprep.mubr.bf16.mxu1 %v2758_v3 }
  0x2f   :  { %1173 = vperm.xlu0 %2620, %v1122_v63  }
  0x35   :  { %2269 = vmatmul.mubr.msk.bf16.gmra.mrb[16].mxu0 %vm317_vm0, %v2952_v8  ;;  %2277 = vmatmul.mubr.msk.bf16.gmra.mrb[16].mxu1 %vm317_vm0, %v2952_v8 }
  0x36   :  { %424 = vmatprep.mubr.bf16.mxu0 %v2758_v3  ;;  %537 = vmatprep.mubr.bf16.mxu1 %v2758_v3 }
  0x3d   :  { %2270 = vmatmul.mubr.msk.bf16.gmra.mrb[20].mxu0 %vm317_vm0, %v2963_v9  ;;  %2278 = vmatmul.mubr.msk.bf16.gmra.mrb[20].mxu1 %vm317_vm0, %v2963_v9 }
  0x3e   :  { %434 = vmatprep.mubr.bf16.mxu0 %v2758_v3  ;;  %547 = vmatprep.mubr.bf16.mxu1 %v2758_v3 }
  0x45   :  { %2271 = vmatmul.mubr.msk.bf16.gmra.mrb[24].mxu0 %vm317_vm0, %v2974_v10  ;;  %2279 = vmatmul.mubr.msk.bf16.gmra.mrb[24].mxu1 %vm317_vm0, %v2974_v10 }
  0x46   :  { %444 = vmatprep.mubr.bf16.mxu0 %v2758_v3  ;;  %557 = vmatprep.mubr.bf16.mxu1 %v2758_v3 }
  0x4d   :  { %2272 = vmatmul.mubr.msk.bf16.gmra.mrb[28].mxu0 %vm317_vm0, %v2985_v11  ;;  %2280 = vmatmul.mubr.msk.bf16.gmra.mrb[28].mxu1 %vm317_vm0, %v2985_v11 }
  0x4e   :  { %600 = vmatprep.mubr.bf16.mxu0 %v2758_v3  ;;  %713 = vmatprep.mubr.bf16.mxu1 %v2758_v3 }
  0x55   :  { %2281 = vmatmul.mubr.msk.bf16.vlgmr.msra.gmra.mrb[32].mxu0 %vm317_vm0, %v2866_v37  ;;  %2289 = vmatmul.mubr.msk.bf16.vlgmr.msra.gmra.mrb[32].mxu1 %vm317_vm0, %v2866_v37  ;;  %v2657_v37 = vld [vmem:[%s3756_s3 + $0xb0] sm:$0xff]  }
  0x56   :  { %610 = vmatprep.mubr.bf16.mxu0 %v2758_v3  ;;  %723 = vmatprep.mubr.bf16.mxu1 %v2758_v3 }
  0x57   :  { %2364 = vmatpush3.bf16.msra.mxu0 %v2631_v12  ;;  %2428 = vmatpush3.bf16.msra.mxu1 %v2633_v13 }
  0x58   :  { %2365 = vmatprep.subr.bf16.mxu0 %v2634_v14  ;;  %2429 = vmatprep.subr.bf16.mxu1 %v2636_v15 }
  0x5b   :  { %2366 = vmatpush3.bf16.msra.mxu0 %v2635_v16  ;;  %2430 = vmatpush3.bf16.msra.mxu1 %v2637_v17  ;;  %v1124_v17 = vld [vmem:[%s3757_s6 + $0x50] sm:$0xff] }
  0x5c   :  { %2367 = vmatprep.subr.bf16.mxu0 %v2638_v18  ;;  %2431 = vmatprep.subr.bf16.mxu1 %v2640_v19  ;;  %v1125_v18 = vld [vmem:[%s3757_s6 + $0x58] sm:$0xff] }
  0x5d   :  { %2282 = vmatmul.mubr.msk.bf16.gmra.mrb[36].mxu0 %vm317_vm0, %v2900_v53  ;;  %2290 = vmatmul.mubr.msk.bf16.gmra.mrb[36].mxu1 %vm317_vm0, %v2900_v53  ;;  %v3162_v53 = vld [vmem:[%s3758_s2] sm:$0xff] }
  0x5e   :  { %620 = vmatprep.mubr.bf16.mxu0 %v2758_v3  ;;  %733 = vmatprep.mubr.bf16.mxu1 %v2758_v3  ;;  %v3171_v58 = vrot.slane %v3162_v53, %v79_v52  ;;  %v3174_v59 = vrot.slane %v3162_v53, %v87_v54  ;;  %v3177_v60 = vrot.slane %v3162_v53, %v83_v55  ;;  %v2667_v55 = vld [vmem:[%s3756_s3 + $0x108] sm:$0xff]  }
  0x5f   :  { %2368 = vmatpush3.bf16.msra.mxu0 %v2639_v20  ;;  %2432 = vmatpush3.bf16.msra.mxu1 %v2641_v21  ;;  %v3180_v61 = vrot.slane %v3162_v53, %v91_v57 }
  0x60   :  { %2369 = vmatprep.subr.bf16.mxu0 %v2642_v22  ;;  %2433 = vmatprep.subr.bf16.mxu1 %v2644_v23 }
  0x61   :  { %1183 = vperm.xlu0 %2620, %v1124_v17  }
  0x63   :  { %2370 = vmatpush3.bf16.msra.mxu0 %v2643_v24  ;;  %2434 = vmatpush3.bf16.msra.mxu1 %v2645_v25 }
  0x64   :  { %2371 = vmatprep.subr.bf16.mxu0 %v2646_v26  ;;  %2435 = vmatprep.subr.bf16.mxu1 %v2648_v27  ;;  %v1126_v26 = vld [vmem:[%s3757_s6 + $0x60] sm:$0xff] }
  0x65   :  { %2283 = vmatmul.mubr.msk.bf16.gmra.mrb[40].mxu0 %vm317_vm0, %v2924_v1  ;;  %2291 = vmatmul.mubr.msk.bf16.gmra.mrb[40].mxu1 %vm317_vm0, %v2924_v1 }
  0x66   :  { %630 = vmatprep.mubr.bf16.mxu0 %v2758_v3  ;;  %743 = vmatprep.mubr.bf16.mxu1 %v2758_v3 }
  0x67   :  { %2372 = vmatpush3.bf16.msra.mxu0 %v2647_v28  ;;  %2436 = vmatpush3.bf16.msra.mxu1 %v2649_v29  ;;  %v1127_v29 = vld [vmem:[%s3757_s6 + $0x68] sm:$0xff] }
  0x68   :  { %2373 = vmatprep.subr.bf16.mxu0 %v2650_v30  ;;  %2437 = vmatprep.subr.bf16.mxu1 %v2652_v31 }
  0x69   :  { %1193 = vperm.xlu0 %2620, %v1126_v26  }
  0x6b   :  { %2374 = vmatpush3.bf16.msra.mxu0 %v2651_v32  ;;  %2438 = vmatpush3.bf16.msra.mxu1 %v2653_v33  ;;  %v2663_v33 = vld [vmem:[%s3756_s3 + $0x100] sm:$0xff]  }
  0x6c   :  { %2375 = vmatprep.subr.bf16.mxu0 %v2654_v34  ;;  %2439 = vmatprep.subr.bf16.mxu1 %v2656_v35 }
  0x6d   :  { %2284 = vmatmul.mubr.msk.bf16.gmra.mrb[44].mxu0 %vm317_vm0, %v2941_v7  ;;  %2292 = vmatmul.mubr.msk.bf16.gmra.mrb[44].mxu1 %vm317_vm0, %v2941_v7 }
  0x6e   :  { %640 = vmatprep.mubr.bf16.mxu0 %v2758_v3  ;;  %753 = vmatprep.mubr.bf16.mxu1 %v2758_v3 }
  0x6f   :  { %2376 = vmatpush3.bf16.msra.mxu0 %v2655_v36  ;;  %2440 = vmatpush3.bf16.msra.mxu1 %v2657_v37 }
  0x70   :  { %2377 = vmatprep.subr.bf16.mxu0 %v2658_v38  ;;  %2441 = vmatprep.subr.bf16.mxu1 %v2660_v39  ;;  %v2665_v38 = vld [vmem:[%s3756_s3 + $0x180] sm:$0xff]   ;;  %v2666_v39 = vld [vmem:[%s3756_s3 + $0x148] sm:$0xff]  }
  0x71   :  { %1203 = vperm.xlu0 %2620, %v1128_v48   ;;  %v2679_v48 = vld [vmem:[%s3756_s3 + $0x120] sm:$0xff]  }
  0x73   :  { %2378 = vmatpush3.bf16.msra.mxu0 %v2659_v40  ;;  %2442 = vmatpush3.bf16.msra.mxu1 %v2661_v41 }
  0x74   :  { %2491 = vmatprep.subr.bf16.mxu0 %v2662_v42  ;;  %2555 = vmatprep.subr.bf16.mxu1 %v2664_v43 }
  0x75   :  { %2285 = vmatmul.mubr.msk.bf16.gmra.mrb[48].mxu0 %vm317_vm0, %v2952_v8  ;;  %2293 = vmatmul.mubr.msk.bf16.gmra.mrb[48].mxu1 %vm317_vm0, %v2952_v8 }
  0x76   :  { %650 = vmatprep.mubr.bf16.mxu0 %v2758_v3  ;;  %763 = vmatprep.mubr.bf16.mxu1 %v2758_v3 }
  0x7d   :  { %2286 = vmatmul.mubr.msk.bf16.gmra.mrb[52].mxu0 %vm317_vm0, %v2963_v9  ;;  %2294 = vmatmul.mubr.msk.bf16.gmra.mrb[52].mxu1 %vm317_vm0, %v2963_v9 }
  0x7e   :  { %660 = vmatprep.mubr.bf16.mxu0 %v2758_v3  ;;  %773 = vmatprep.mubr.bf16.mxu1 %v2758_v3 }
  0x85   :  { %2287 = vmatmul.mubr.msk.bf16.gmra.mrb[56].mxu0 %vm317_vm0, %v2974_v10  ;;  %2295 = vmatmul.mubr.msk.bf16.gmra.mrb[56].mxu1 %vm317_vm0, %v2974_v10 }
  0x86   :  { %670 = vmatprep.mubr.bf16.mxu0 %v2758_v3  ;;  %783 = vmatprep.mubr.bf16.mxu1 %v2758_v3  ;;  %v1116_v3 = vld [vmem:[%s3757_s6 + $0x10] sm:$0xff] }
  0x87   :  { %1143 = vperm.xlu1 %2621, %v1116_v3  }
  0x8b   :  { %1148 = vperm.xlu1 %2621, %v1117_v46  }
  0x8d   :  { %2288 = vmatmul.mubr.msk.bf16.gmra.mrb[60].mxu0 %vm317_vm0, %v2985_v11  ;;  %2296 = vmatmul.mubr.msk.bf16.gmra.mrb[60].mxu1 %vm317_vm0, %v2985_v11 }
  0x8f   :  { %1158 = vperm.xlu1 %2621, %v1119_v49  }
  0x93   :  { %1168 = vperm.xlu1 %2621, %v1121_v56   ;;  %v1129_v56 = vld [vmem:[%s3757_s6 + $0x78] sm:$0xff] }
  0x97   :  { %1178 = vperm.xlu1 %2621, %v1123_v4  }
  0x9b   :  { %1188 = vperm.xlu1 %2621, %v1125_v18   ;;  %v2673_v18 = vld [vmem:[%s3756_s3 + $0x190] sm:$0xff]  }
  0x9f   :  { %1198 = vperm.xlu1 %2621, %v1127_v29  }
  0xa3   :  { %1208 = vperm.xlu1 %2621, %v1129_v56   ;;  %v2682_v56 = vld [vmem:[%s3756_s3 + $0x168] sm:$0xff]  }
  0xe8   :  { %v376_v62 = vpop.f32.mrb[0].mxu0  ;;  %v489_v1 = vpop.f32.mrb[0].mxu1 }
  0xe9   :  { %v377_v0 = vadd.f32 %v376_v62, %v3171_v58  ;;  %v378_v2 = vpop.f32.mrb[1].mxu0  ;;  %v490_v5 = vadd.f32 %v489_v1, %v3174_v59  ;;  %v491_v7 = vpop.f32.mrb[1].mxu1  ;;  %v2669_v1 = vld [vmem:[%s3756_s3 + $0x188] sm:$0xff]  }
  0xea   :  { %v379_v6 = vadd.f32 %v378_v2, %v3177_v60  ;;  %v380_v8 = vpop.f32.mrb[2].mxu0  ;;  %v492_v9 = vadd.f32 %v491_v7, %v3180_v61  ;;  %v493_v11 = vpop.f32.mrb[2].mxu1  ;;  %v2670_v2 = vld [vmem:[%s3756_s3 + $0x150] sm:$0xff]  }
  0xeb   :  { %v381_v10 = vadd.f32 %v380_v8, %v3171_v58  ;;  %v382_v12 = vpop.f32.mrb[3].mxu0  ;;  %v796_v13 = vmax.f32 %v490_v5, 0.0  ;;  %v494_v14 = vadd.f32 %v493_v11, %v3174_v59  ;;  %v495_v16 = vpop.f32.mrb[3].mxu1  ;;  %v794_v19 = vmax.f32 %v377_v0, 0.0  ;;  %v2672_v7 = vld [vmem:[%s3756_s3 + $0x1d0] sm:$0xff]  }
  0xec   :  { %v383_v15 = vadd.f32 %v382_v12, %v3177_v60  ;;  %v797_v20 = vmax.f32 %v492_v9, 0.0  ;;  %v496_v22 = vadd.f32 %v495_v16, %v3180_v61  ;;  %v795_v23 = vmax.f32 %v379_v6, 0.0 }
  0xed   :  { %v802_v21 = vmax.f32 %v381_v10, 0.0  ;;  %v804_v24 = vmax.f32 %v494_v14, 0.0 }
  0xee   :  { %v803_v25 = vmax.f32 %v383_v15, 0.0  ;;  %v805_v28 = vmax.f32 %v496_v22, 0.0 }
  0xef   :  { %v922_v27 = vpack.c.bf16 %v802_v21, %v794_v19  ;;  %v924_v30 = vpack.c.bf16 %v804_v24, %v796_v13  ;;  %v2671_v13 = vld [vmem:[%s3756_s3 + $0x110] sm:$0xff]   ;;  %v2674_v19 = vld [vmem:[%s3756_s3 + $0x158] sm:$0xff]  }
  0xf0   :  { %v923_v31 = vpack.c.bf16 %v803_v25, %v795_v23  ;;  %v386_v32 = vpop.f32.mrb[4].mxu0  ;;  %v925_v34 = vpack.c.bf16 %v805_v28, %v797_v20  ;;  %v499_v36 = vpop.f32.mrb[4].mxu1  ;;  %v2676_v24 = vld [vmem:[%s3756_s3 + $0x1d8] sm:$0xff]  }
  0xf1   :  { %v387_v35 = vadd.f32 %v386_v32, %v3171_v58  ;;  %v388_v37 = vpop.f32.mrb[5].mxu0  ;;  %v500_v40 = vadd.f32 %v499_v36, %v3174_v59  ;;  %v501_v42 = vpop.f32.mrb[5].mxu1 }
  0xf2   :  { %v389_v41 = vadd.f32 %v388_v37, %v3177_v60  ;;  %v390_v43 = vpop.f32.mrb[6].mxu0  ;;  %1649 = vmatprep.mubr.bf16.mxu0 %v923_v31  ;;  %v502_v45 = vadd.f32 %v501_v42, %v3180_v61  ;;  %v503_v46 = vpop.f32.mrb[6].mxu1  ;;  %1746 = vmatprep.mubr.bf16.mxu1 %v925_v34 }
  0xf3   :  { %v391_v3 = vadd.f32 %v390_v43, %v3171_v58  ;;  %v392_v47 = vpop.f32.mrb[7].mxu0  ;;  %1650 = vmatmul.mubr.bf16.vlgmr.msra.gmra.mrb[64].mxu0 %v922_v27  ;;  %v812_v49 = vmax.f32 %v500_v40, 0.0  ;;  %v504_v51 = vadd.f32 %v503_v46, %v3174_v59  ;;  %v505_v54 = vpop.f32.mrb[7].mxu1  ;;  %1747 = vmatmul.mubr.bf16.vlgmr.msra.gmra.mrb[64].mxu1 %v924_v30  ;;  %v810_v57 = vmax.f32 %v387_v35, 0.0  ;;  %v2680_v43 = vld [vmem:[%s3756_s3 + $0x1e0] sm:$0xff]  }
  0xf4   :  { %v393_v52 = vadd.f32 %v392_v47, %v3177_v60  ;;  %2492 = vmatpush3.bf16.msra.mxu0 %v2663_v33  ;;  %v813_v62 = vmax.f32 %v502_v45, 0.0  ;;  %v506_v0 = vadd.f32 %v505_v54, %v3180_v61  ;;  %2556 = vmatpush3.bf16.msra.mxu1 %v2665_v38  ;;  %v811_v4 = vmax.f32 %v389_v41, 0.0  ;;  %v2675_v33 = vld [vmem:[%s3756_s3 + $0x118] sm:$0xff]  }
  0xf5   :  { %v818_v63 = vmax.f32 %v391_v3, 0.0  ;;  %2493 = vmatprep.subr.bf16.mxu0 %v2666_v39  ;;  %v820_v5 = vmax.f32 %v504_v51, 0.0  ;;  %2557 = vmatprep.subr.bf16.mxu1 %v2668_v44  ;;  %v2677_v38 = vld [vmem:[%s3756_s3 + $0x198] sm:$0xff]   ;;  %v2678_v39 = vld [vmem:[%s3756_s3 + $0x160] sm:$0xff]  }
  0xf6   :  { %v819_v6 = vmax.f32 %v393_v52, 0.0  ;;  %v821_v9 = vmax.f32 %v506_v0, 0.0 }
  0xf7   :  { %v930_v8 = vpack.c.bf16 %v818_v63, %v810_v57  ;;  %v932_v10 = vpack.c.bf16 %v820_v5, %v812_v49 }
  0xf8   :  { %v931_v11 = vpack.c.bf16 %v819_v6, %v811_v4  ;;  %v396_v12 = vpop.f32.mrb[8].mxu0  ;;  %2494 = vmatpush3.bf16.msra.mxu0 %v2667_v55  ;;  %v933_v14 = vpack.c.bf16 %v821_v9, %v813_v62  ;;  %v509_v16 = vpop.f32.mrb[8].mxu1  ;;  %2558 = vmatpush3.bf16.msra.mxu1 %v2669_v1  ;;  %v2681_v55 = vld [vmem:[%s3756_s3 + $0x1a0] sm:$0xff]   ;;  %v2684_v1 = vld [vmem:[%s3756_s3 + $0x1e8] sm:$0xff]  }
  0xf9   :  { %v397_v15 = vadd.f32 %v396_v12, %v3171_v58  ;;  %v398_v17 = vpop.f32.mrb[9].mxu0  ;;  %2495 = vmatprep.subr.bf16.mxu0 %v2670_v2  ;;  %v510_v20 = vadd.f32 %v509_v16, %v3174_v59  ;;  %v511_v22 = vpop.f32.mrb[9].mxu1  ;;  %2559 = vmatprep.subr.bf16.mxu1 %v2672_v7  ;;  %v2685_v16 = vld [vmem:[%s3756_s3 + $0x1a8] sm:$0xff]  }
  0xfa   :  { %v399_v21 = vadd.f32 %v398_v17, %v3177_v60  ;;  %v400_v23 = vpop.f32.mrb[10].mxu0  ;;  %1657 = vmatprep.mubr.bf16.mxu0 %v931_v11  ;;  %v512_v25 = vadd.f32 %v511_v22, %v3180_v61  ;;  %v513_v27 = vpop.f32.mrb[10].mxu1  ;;  %1754 = vmatprep.mubr.bf16.mxu1 %v933_v14  ;;  %v2683_v11 = vld [vmem:[%s3756_s3 + $0x128] sm:$0xff]   ;;  %v2686_v17 = vld [vmem:[%s3756_s3 + $0x170] sm:$0xff]  }
  0xfb   :  { %v401_v26 = vadd.f32 %v400_v23, %v3171_v58  ;;  %v402_v28 = vpop.f32.mrb[11].mxu0  ;;  %1658 = vmatmul.mubr.bf16.gmra.mrb[68].mxu0 %v930_v8  ;;  %v828_v29 = vmax.f32 %v510_v20, 0.0  ;;  %v514_v30 = vadd.f32 %v513_v27, %v3174_v59  ;;  %v515_v32 = vpop.f32.mrb[11].mxu1  ;;  %1755 = vmatmul.mubr.bf16.gmra.mrb[68].mxu1 %v932_v10  ;;  %v826_v34 = vmax.f32 %v397_v15, 0.0  ;;  %v2687_v27 = vld [vmem:[%s3756_s3 + $0x130] sm:$0xff]  }
  0xfc   :  { %v403_v31 = vadd.f32 %v402_v28, %v3177_v60  ;;  %2496 = vmatpush3.bf16.msra.mxu0 %v2671_v13  ;;  %v829_v35 = vmax.f32 %v512_v25, 0.0  ;;  %v516_v37 = vadd.f32 %v515_v32, %v3180_v61  ;;  %2560 = vmatpush3.bf16.msra.mxu1 %v2673_v18  ;;  %v827_v40 = vmax.f32 %v399_v21, 0.0  ;;  %v2688_v21 = vld [vmem:[%s3756_s3 + $0x1f0] sm:$0xff]  }
  0xfd   :  { %v834_v36 = vmax.f32 %v401_v26, 0.0  ;;  %2497 = vmatprep.subr.bf16.mxu0 %v2674_v19  ;;  %v836_v41 = vmax.f32 %v514_v30, 0.0  ;;  %2561 = vmatprep.subr.bf16.mxu1 %v2676_v24  ;;  %v2689_v32 = vld [vmem:[%s3756_s3 + $0x1b0] sm:$0xff]  }
  0xfe   :  { %v835_v42 = vmax.f32 %v403_v31, 0.0  ;;  %v837_v45 = vmax.f32 %v516_v37, 0.0 }
  0xff   :  { %v938_v44 = vpack.c.bf16 %v834_v36, %v826_v34  ;;  %v940_v3 = vpack.c.bf16 %v836_v41, %v828_v29 }
 0x100   :  { %v939_v46 = vpack.c.bf16 %v835_v42, %v827_v40  ;;  %v406_v47 = vpop.f32.mrb[12].mxu0  ;;  %2498 = vmatpush3.bf16.msra.mxu0 %v2675_v33  ;;  %v941_v49 = vpack.c.bf16 %v837_v45, %v829_v35  ;;  %v519_v52 = vpop.f32.mrb[12].mxu1  ;;  %2562 = vmatpush3.bf16.msra.mxu1 %v2677_v38  ;;  %v2690_v33 = vld [vmem:[%s3756_s3 + $0x178] sm:$0xff]  }
 0x101   :  { %v407_v51 = vadd.f32 %v406_v47, %v3171_v58  ;;  %v408_v54 = vpop.f32.mrb[13].mxu0  ;;  %2499 = vmatprep.subr.bf16.mxu0 %v2678_v39  ;;  %v520_v57 = vadd.f32 %v519_v52, %v3174_v59  ;;  %v521_v63 = vpop.f32.mrb[13].mxu1  ;;  %2563 = vmatprep.subr.bf16.mxu1 %v2680_v43  ;;  %v2692_v38 = vld [vmem:[%s3756_s3 + $0x1f8] sm:$0xff]  }
 0x102   :  { %v409_v62 = vadd.f32 %v408_v54, %v3177_v60  ;;  %v410_v0 = vpop.f32.mrb[14].mxu0  ;;  %1665 = vmatprep.mubr.bf16.mxu0 %v939_v46  ;;  %v522_v2 = vadd.f32 %v521_v63, %v3180_v61  ;;  %v523_v5 = vpop.f32.mrb[14].mxu1  ;;  %1762 = vmatprep.mubr.bf16.mxu1 %v941_v49  ;;  %v2691_v46 = vld [vmem:[%s3756_s3 + $0x138] sm:$0xff]  }
 0x103   :  { %v411_v4 = vadd.f32 %v410_v0, %v3171_v58  ;;  %v412_v6 = vpop.f32.mrb[15].mxu0  ;;  %1666 = vmatmul.mubr.bf16.gmra.mrb[72].mxu0 %v938_v44  ;;  %v844_v7 = vmax.f32 %v520_v57, 0.0  ;;  %v524_v8 = vadd.f32 %v523_v5, %v3174_v59  ;;  %v525_v10 = vpop.f32.mrb[15].mxu1  ;;  %1763 = vmatmul.mubr.bf16.gmra.mrb[72].mxu1 %v940_v3  ;;  %v842_v12 = vmax.f32 %v407_v51, 0.0  ;;  %v2693_v52 = vld [vmem:[%s3756_s3 + $0x1b8] sm:$0xff]  }
 0x104   :  { %v413_v9 = vadd.f32 %v412_v6, %v3177_v60  ;;  %2500 = vmatpush3.bf16.msra.mxu0 %v2679_v48  ;;  %v845_v13 = vmax.f32 %v522_v2, 0.0  ;;  %v526_v15 = vadd.f32 %v525_v10, %v3180_v61  ;;  %2564 = vmatpush3.bf16.msra.mxu1 %v2681_v55  ;;  %v843_v18 = vmax.f32 %v409_v62, 0.0 }
 0x105   :  { %v850_v14 = vmax.f32 %v411_v4, 0.0  ;;  %2501 = vmatprep.subr.bf16.mxu0 %v2682_v56  ;;  %v852_v19 = vmax.f32 %v524_v8, 0.0  ;;  %2565 = vmatprep.subr.bf16.mxu1 %v2684_v1 }
 0x106   :  { %v851_v20 = vmax.f32 %v413_v9, 0.0  ;;  %v853_v23 = vmax.f32 %v526_v15, 0.0 }
 0x107   :  { %v946_v22 = vpack.c.bf16 %v850_v14, %v842_v12  ;;  %v948_v24 = vpack.c.bf16 %v852_v19, %v844_v7 }
 0x108   :  { %v947_v25 = vpack.c.bf16 %v851_v20, %v843_v18  ;;  %v416_v26 = vpop.f32.mrb[16].mxu0  ;;  %2502 = vmatpush3.bf16.msra.mxu0 %v2683_v11  ;;  %v949_v28 = vpack.c.bf16 %v853_v23, %v845_v13  ;;  %v529_v30 = vpop.f32.mrb[16].mxu1  ;;  %2566 = vmatpush3.bf16.msra.mxu1 %v2685_v16 }
 0x109   :  { %v417_v29 = vadd.f32 %v416_v26, %v3171_v58  ;;  %v418_v31 = vpop.f32.mrb[17].mxu0  ;;  %2503 = vmatprep.subr.bf16.mxu0 %v2686_v17  ;;  %v530_v34 = vadd.f32 %v529_v30, %v3174_v59  ;;  %v531_v36 = vpop.f32.mrb[17].mxu1  ;;  %2567 = vmatprep.subr.bf16.mxu1 %v2688_v21 }
 0x10a   :  { %v419_v35 = vadd.f32 %v418_v31, %v3177_v60  ;;  %v420_v37 = vpop.f32.mrb[18].mxu0  ;;  %1673 = vmatprep.mubr.bf16.mxu0 %v947_v25  ;;  %v532_v39 = vadd.f32 %v531_v36, %v3180_v61  ;;  %v533_v41 = vpop.f32.mrb[18].mxu1  ;;  %1770 = vmatprep.mubr.bf16.mxu1 %v949_v28 }
 0x10b   :  { %v421_v40 = vadd.f32 %v420_v37, %v3171_v58  ;;  %v422_v42 = vpop.f32.mrb[19].mxu0  ;;  %1674 = vmatmul.mubr.bf16.gmra.mrb[76].mxu0 %v946_v22  ;;  %v860_v43 = vmax.f32 %v530_v34, 0.0  ;;  %v534_v44 = vadd.f32 %v533_v41, %v3174_v59  ;;  %v535_v3 = vpop.f32.mrb[19].mxu1  ;;  %1771 = vmatmul.mubr.bf16.gmra.mrb[76].mxu1 %v948_v24  ;;  %v858_v47 = vmax.f32 %v417_v29, 0.0 }
 0x10c   :  { %v423_v45 = vadd.f32 %v422_v42, %v3177_v60  ;;  %2504 = vmatpush3.bf16.msra.mxu0 %v2687_v27  ;;  %v861_v48 = vmax.f32 %v532_v39, 0.0  ;;  %v536_v51 = vadd.f32 %v535_v3, %v3180_v61  ;;  %2568 = vmatpush3.bf16.msra.mxu1 %v2689_v32  ;;  %v859_v54 = vmax.f32 %v419_v35, 0.0 }
 0x10d   :  { %v866_v49 = vmax.f32 %v421_v40, 0.0  ;;  %2505 = vmatprep.subr.bf16.mxu0 %v2690_v33  ;;  %v868_v55 = vmax.f32 %v534_v44, 0.0  ;;  %2569 = vmatprep.subr.bf16.mxu1 %v2692_v38 }
 0x10e   :  { %v867_v56 = vmax.f32 %v423_v45, 0.0  ;;  %v869_v62 = vmax.f32 %v536_v51, 0.0 }
 0x10f   :  { %v954_v57 = vpack.c.bf16 %v866_v49, %v858_v47  ;;  %v956_v63 = vpack.c.bf16 %v868_v55, %v860_v43 }
 0x110   :  { %v955_v0 = vpack.c.bf16 %v867_v56, %v859_v54  ;;  %v426_v1 = vpop.f32.mrb[20].mxu0  ;;  %2506 = vmatpush3.bf16.msra.mxu0 %v2691_v46  ;;  %v957_v2 = vpack.c.bf16 %v869_v62, %v861_v48  ;;  %v539_v5 = vpop.f32.mrb[20].mxu1  ;;  %2570 = vmatpush3.bf16.msra.mxu1 %v2693_v52 }
 0x111   :  { %v427_v4 = vadd.f32 %v426_v1, %v3171_v58  ;;  %v428_v6 = vpop.f32.mrb[21].mxu0  ;;  %v540_v7 = vadd.f32 %v539_v5, %v3174_v59  ;;  %v541_v9 = vpop.f32.mrb[21].mxu1  ;;  %v99_v1 = vsub.s32 5, %v3153_v50 }
 0x112   :  { %v429_v8 = vadd.f32 %v428_v6, %v3177_v60  ;;  %v430_v10 = vpop.f32.mrb[22].mxu0  ;;  %1681 = vmatprep.mubr.bf16.mxu0 %v955_v0  ;;  %v542_v11 = vadd.f32 %v541_v9, %v3180_v61  ;;  %v543_v13 = vpop.f32.mrb[22].mxu1  ;;  %1778 = vmatprep.mubr.bf16.mxu1 %v957_v2 }
 0x113   :  { %v431_v12 = vadd.f32 %v430_v10, %v3171_v58  ;;  %v432_v14 = vpop.f32.mrb[23].mxu0  ;;  %1682 = vmatmul.mubr.bf16.gmra.mrb[80].mxu0 %v954_v57  ;;  %v876_v15 = vmax.f32 %v540_v7, 0.0  ;;  %v544_v16 = vadd.f32 %v543_v13, %v3174_v59  ;;  %v545_v18 = vpop.f32.mrb[23].mxu1  ;;  %1779 = vmatmul.mubr.bf16.gmra.mrb[80].mxu1 %v956_v63  ;;  %v874_v19 = vmax.f32 %v427_v4, 0.0 }
 0x114   :  { %v433_v17 = vadd.f32 %v432_v14, %v3177_v60  ;;  %v877_v20 = vmax.f32 %v542_v11, 0.0  ;;  %v546_v22 = vadd.f32 %v545_v18, %v3180_v61  ;;  %v875_v23 = vmax.f32 %v429_v8, 0.0 }
 0x115   :  { %v882_v21 = vmax.f32 %v431_v12, 0.0  ;;  %v884_v24 = vmax.f32 %v544_v16, 0.0  ;;  %v95_v57 = vsub.s32 4, %v3153_v50  ;;  %v103_v11 = vsub.s32 6, %v3153_v50 }
 0x116   :  { %v883_v25 = vmax.f32 %v433_v17, 0.0  ;;  %v885_v27 = vmax.f32 %v546_v22, 0.0  ;;  %v107_v17 = vsub.s32 7, %v3153_v50  ;;  %v3367_v22 = vrot.slane %v3162_v53, %v99_v1 }
 0x117   :  { %v962_v26 = vpack.c.bf16 %v882_v21, %v874_v19  ;;  %v964_v28 = vpack.c.bf16 %v884_v24, %v876_v15  ;;  %v3361_v16 = vrot.slane %v3162_v53, %v95_v57  ;;  %v3371_v50 = vrot.slane %v3162_v53, %v103_v11 }
 0x118   :  { %v963_v29 = vpack.c.bf16 %v883_v25, %v875_v23  ;;  %v436_v30 = vpop.f32.mrb[24].mxu0  ;;  %v965_v31 = vpack.c.bf16 %v885_v27, %v877_v20  ;;  %v549_v33 = vpop.f32.mrb[24].mxu1 }
 0x119   :  { %v437_v32 = vadd.f32 %v436_v30, %v3171_v58  ;;  %v438_v34 = vpop.f32.mrb[25].mxu0  ;;  %v550_v35 = vadd.f32 %v549_v33, %v3174_v59  ;;  %v551_v37 = vpop.f32.mrb[25].mxu1 }
 0x11a   :  { %v439_v36 = vadd.f32 %v438_v34, %v3177_v60  ;;  %v440_v38 = vpop.f32.mrb[26].mxu0  ;;  %1689 = vmatprep.mubr.bf16.mxu0 %v963_v29  ;;  %v552_v39 = vadd.f32 %v551_v37, %v3180_v61  ;;  %v553_v41 = vpop.f32.mrb[26].mxu1  ;;  %1786 = vmatprep.mubr.bf16.mxu1 %v965_v31 }
 0x11b   :  { %v441_v40 = vadd.f32 %v440_v38, %v3171_v58  ;;  %v442_v42 = vpop.f32.mrb[27].mxu0  ;;  %1690 = vmatmul.mubr.bf16.gmra.mrb[84].mxu0 %v962_v26  ;;  %v892_v43 = vmax.f32 %v550_v35, 0.0  ;;  %v554_v44 = vadd.f32 %v553_v41, %v3174_v59  ;;  %v555_v3 = vpop.f32.mrb[27].mxu1  ;;  %1787 = vmatmul.mubr.bf16.gmra.mrb[84].mxu1 %v964_v28  ;;  %v890_v46 = vmax.f32 %v437_v32, 0.0 }
 0x11c   :  { %v443_v45 = vadd.f32 %v442_v42, %v3177_v60  ;;  %v893_v47 = vmax.f32 %v552_v39, 0.0  ;;  %v556_v49 = vadd.f32 %v555_v3, %v3180_v61  ;;  %v891_v51 = vmax.f32 %v439_v36, 0.0 }
 0x11d   :  { %v898_v48 = vmax.f32 %v441_v40, 0.0  ;;  %v900_v52 = vmax.f32 %v554_v44, 0.0 }
 0x11e   :  { %v899_v54 = vmax.f32 %v443_v45, 0.0  ;;  %v901_v56 = vmax.f32 %v556_v49, 0.0 }
 0x11f   :  { %v970_v55 = vpack.c.bf16 %v898_v48, %v890_v46  ;;  %v972_v62 = vpack.c.bf16 %v900_v52, %v892_v43 }
 0x120   :  { %v971_v63 = vpack.c.bf16 %v899_v54, %v891_v51  ;;  %v446_v0 = vpop.f32.mrb[28].mxu0  ;;  %v973_v2 = vpack.c.bf16 %v901_v56, %v893_v47  ;;  %v559_v5 = vpop.f32.mrb[28].mxu1 }
 0x121   :  { %v447_v4 = vadd.f32 %v446_v0, %v3171_v58  ;;  %v448_v6 = vpop.f32.mrb[29].mxu0  ;;  %v560_v7 = vadd.f32 %v559_v5, %v3174_v59  ;;  %v561_v9 = vpop.f32.mrb[29].mxu1 }
 0x122   :  { %v449_v8 = vadd.f32 %v448_v6, %v3177_v60  ;;  %v450_v10 = vpop.f32.mrb[30].mxu0  ;;  %1697 = vmatprep.mubr.bf16.mxu0 %v971_v63  ;;  %v562_v12 = vadd.f32 %v561_v9, %v3180_v61  ;;  %v563_v14 = vpop.f32.mrb[30].mxu1  ;;  %1794 = vmatprep.mubr.bf16.mxu1 %v973_v2 }
 0x123   :  { %v451_v13 = vadd.f32 %v450_v10, %v3171_v58  ;;  %v452_v15 = vpop.f32.mrb[31].mxu0  ;;  %1698 = vmatmul.mubr.bf16.gmra.mrb[88].mxu0 %v970_v55  ;;  %v908_v18 = vmax.f32 %v560_v7, 0.0  ;;  %v564_v19 = vadd.f32 %v563_v14, %v3174_v59  ;;  %v565_v21 = vpop.f32.mrb[31].mxu1  ;;  %1795 = vmatmul.mubr.bf16.gmra.mrb[88].mxu1 %v972_v62  ;;  %v906_v58 = vmax.f32 %v447_v4, 0.0 }
 0x124   :  { %v453_v20 = vadd.f32 %v452_v15, %v3177_v60  ;;  %v909_v23 = vmax.f32 %v562_v12, 0.0  ;;  %v566_v25 = vadd.f32 %v565_v21, %v3180_v61  ;;  %v907_v26 = vmax.f32 %v449_v8, 0.0 }
 0x125   :  { %v914_v24 = vmax.f32 %v451_v13, 0.0  ;;  %v916_v27 = vmax.f32 %v564_v19, 0.0  ;;  %v3374_v60 = vrot.slane %v3162_v53, %v107_v17 }
 0x126   :  { %v915_v28 = vmax.f32 %v453_v20, 0.0  ;;  %v917_v59 = vmax.f32 %v566_v25, 0.0 }
 0x127   :  { %v978_v29 = vpack.c.bf16 %v914_v24, %v906_v58  ;;  %v980_v30 = vpack.c.bf16 %v916_v27, %v908_v18 }
 0x128   :  { %v979_v31 = vpack.c.bf16 %v915_v28, %v907_v26  ;;  %v602_v32 = vpop.f32.mrb[32].mxu0  ;;  %v981_v33 = vpack.c.bf16 %v917_v59, %v909_v23  ;;  %v715_v35 = vpop.f32.mrb[32].mxu1 }
 0x129   :  { %v603_v34 = vadd.f32 %v602_v32, %v3361_v16  ;;  %v604_v36 = vpop.f32.mrb[33].mxu0  ;;  %v716_v61 = vadd.f32 %v715_v35, %v3371_v50  ;;  %v717_v38 = vpop.f32.mrb[33].mxu1 }
 0x12a   :  { %v605_v37 = vadd.f32 %v604_v36, %v3367_v22  ;;  %v606_v39 = vpop.f32.mrb[34].mxu0  ;;  %1705 = vmatprep.mubr.bf16.mxu0 %v979_v31  ;;  %v718_v40 = vadd.f32 %v717_v38, %v3374_v60  ;;  %v719_v41 = vpop.f32.mrb[34].mxu1  ;;  %1802 = vmatprep.mubr.bf16.mxu1 %v981_v33 }
 0x12b   :  { %v607_v53 = vadd.f32 %v606_v39, %v3361_v16  ;;  %v608_v42 = vpop.f32.mrb[35].mxu0  ;;  %1706 = vmatmul.mubr.bf16.gmra.mrb[92].mxu0 %v978_v29  ;;  %v800_v43 = vmax.f32 %v716_v61, 0.0  ;;  %v720_v44 = vadd.f32 %v719_v41, %v3371_v50  ;;  %v721_v3 = vpop.f32.mrb[35].mxu1  ;;  %1803 = vmatmul.mubr.bf16.gmra.mrb[92].mxu1 %v980_v30  ;;  %v798_v46 = vmax.f32 %v603_v34, 0.0 }
 0x12c   :  { %v609_v45 = vadd.f32 %v608_v42, %v3367_v22  ;;  %v801_v47 = vmax.f32 %v718_v40, 0.0  ;;  %v722_v49 = vadd.f32 %v721_v3, %v3374_v60  ;;  %v799_v51 = vmax.f32 %v605_v37, 0.0 }
 0x12d   :  { %v806_v48 = vmax.f32 %v607_v53, 0.0  ;;  %v808_v52 = vmax.f32 %v720_v44, 0.0 }
 0x12e   :  { %v807_v54 = vmax.f32 %v609_v45, 0.0  ;;  %v809_v56 = vmax.f32 %v722_v49, 0.0 }
 0x12f   :  { %v926_v55 = vpack.c.bf16 %v806_v48, %v798_v46  ;;  %v928_v57 = vpack.c.bf16 %v808_v52, %v800_v43 }
 0x130   :  { %v927_v62 = vpack.c.bf16 %v807_v54, %v799_v51  ;;  %v612_v63 = vpop.f32.mrb[36].mxu0  ;;  %v929_v0 = vpack.c.bf16 %v809_v56, %v801_v47  ;;  %v725_v2 = vpop.f32.mrb[36].mxu1 }
 0x131   :  { %v613_v1 = vadd.f32 %v612_v63, %v3361_v16  ;;  %v614_v4 = vpop.f32.mrb[37].mxu0  ;;  %v726_v5 = vadd.f32 %v725_v2, %v3371_v50  ;;  %v727_v7 = vpop.f32.mrb[37].mxu1 }
 0x132   :  { %v615_v6 = vadd.f32 %v614_v4, %v3367_v22  ;;  %v616_v8 = vpop.f32.mrb[38].mxu0  ;;  %1843 = vmatprep.mubr.bf16.mxu0 %v927_v62  ;;  %v728_v9 = vadd.f32 %v727_v7, %v3374_v60  ;;  %v729_v11 = vpop.f32.mrb[38].mxu1  ;;  %1940 = vmatprep.mubr.bf16.mxu1 %v929_v0 }
 0x133   :  { %v617_v10 = vadd.f32 %v616_v8, %v3361_v16  ;;  %v618_v12 = vpop.f32.mrb[39].mxu0  ;;  %1844 = vmatmul.mubr.bf16.vlgmr.msra.gmra.mrb[96].mxu0 %v926_v55  ;;  %v816_v13 = vmax.f32 %v726_v5, 0.0  ;;  %v730_v14 = vadd.f32 %v729_v11, %v3371_v50  ;;  %v731_v17 = vpop.f32.mrb[39].mxu1  ;;  %1941 = vmatmul.mubr.bf16.vlgmr.msra.gmra.mrb[96].mxu1 %v928_v57  ;;  %v814_v18 = vmax.f32 %v613_v1, 0.0 }
 0x134   :  { %v619_v15 = vadd.f32 %v618_v12, %v3367_v22  ;;  %v817_v19 = vmax.f32 %v728_v9, 0.0  ;;  %v732_v21 = vadd.f32 %v731_v17, %v3374_v60  ;;  %v815_v58 = vmax.f32 %v615_v6, 0.0 }
 0x135   :  { %v822_v20 = vmax.f32 %v617_v10, 0.0  ;;  %v824_v23 = vmax.f32 %v730_v14, 0.0 }
 0x136   :  { %v823_v24 = vmax.f32 %v619_v15, 0.0  ;;  %v825_v26 = vmax.f32 %v732_v21, 0.0 }
 0x137   :  { %v934_v25 = vpack.c.bf16 %v822_v20, %v814_v18  ;;  %v936_v27 = vpack.c.bf16 %v824_v23, %v816_v13 }
 0x138   :  { %v935_v28 = vpack.c.bf16 %v823_v24, %v815_v58  ;;  %v622_v29 = vpop.f32.mrb[40].mxu0  ;;  %v937_v59 = vpack.c.bf16 %v825_v26, %v817_v19  ;;  %v735_v31 = vpop.f32.mrb[40].mxu1 }
 0x139   :  { %v623_v30 = vadd.f32 %v622_v29, %v3361_v16  ;;  %v624_v32 = vpop.f32.mrb[41].mxu0  ;;  %v736_v33 = vadd.f32 %v735_v31, %v3371_v50  ;;  %v737_v35 = vpop.f32.mrb[41].mxu1 }
 0x13a   :  { %v625_v34 = vadd.f32 %v624_v32, %v3367_v22  ;;  %v626_v36 = vpop.f32.mrb[42].mxu0  ;;  %1851 = vmatprep.mubr.bf16.mxu0 %v935_v28  ;;  %v738_v61 = vadd.f32 %v737_v35, %v3374_v60  ;;  %v739_v38 = vpop.f32.mrb[42].mxu1  ;;  %1948 = vmatprep.mubr.bf16.mxu1 %v937_v59 }
 0x13b   :  { %v627_v37 = vadd.f32 %v626_v36, %v3361_v16  ;;  %v628_v39 = vpop.f32.mrb[43].mxu0  ;;  %1852 = vmatmul.mubr.bf16.gmra.mrb[100].mxu0 %v934_v25  ;;  %v832_v40 = vmax.f32 %v736_v33, 0.0  ;;  %v740_v53 = vadd.f32 %v739_v38, %v3371_v50  ;;  %v741_v42 = vpop.f32.mrb[43].mxu1  ;;  %1949 = vmatmul.mubr.bf16.gmra.mrb[100].mxu1 %v936_v27  ;;  %v830_v43 = vmax.f32 %v623_v30, 0.0 }
 0x13c   :  { %v629_v41 = vadd.f32 %v628_v39, %v3367_v22  ;;  %v833_v44 = vmax.f32 %v738_v61, 0.0  ;;  %v742_v3 = vadd.f32 %v741_v42, %v3374_v60  ;;  %v831_v46 = vmax.f32 %v625_v34, 0.0 }
 0x13d   :  { %v838_v45 = vmax.f32 %v627_v37, 0.0  ;;  %v840_v47 = vmax.f32 %v740_v53, 0.0 }
 0x13e   :  { %v839_v48 = vmax.f32 %v629_v41, 0.0  ;;  %v841_v51 = vmax.f32 %v742_v3, 0.0 }
 0x13f   :  { %v942_v49 = vpack.c.bf16 %v838_v45, %v830_v43  ;;  %v944_v52 = vpack.c.bf16 %v840_v47, %v832_v40 }
 0x140   :  { %v943_v54 = vpack.c.bf16 %v839_v48, %v831_v46  ;;  %v632_v55 = vpop.f32.mrb[44].mxu0  ;;  %v945_v56 = vpack.c.bf16 %v841_v51, %v833_v44  ;;  %v745_v62 = vpop.f32.mrb[44].mxu1 }
 0x141   :  { %v633_v57 = vadd.f32 %v632_v55, %v3361_v16  ;;  %v634_v63 = vpop.f32.mrb[45].mxu0  ;;  %v746_v0 = vadd.f32 %v745_v62, %v3371_v50  ;;  %v747_v2 = vpop.f32.mrb[45].mxu1 }
 0x142   :  { %v635_v1 = vadd.f32 %v634_v63, %v3367_v22  ;;  %v636_v4 = vpop.f32.mrb[46].mxu0  ;;  %1859 = vmatprep.mubr.bf16.mxu0 %v943_v54  ;;  %v748_v5 = vadd.f32 %v747_v2, %v3374_v60  ;;  %v749_v7 = vpop.f32.mrb[46].mxu1  ;;  %1956 = vmatprep.mubr.bf16.mxu1 %v945_v56 }
 0x143   :  { %v637_v6 = vadd.f32 %v636_v4, %v3361_v16  ;;  %v638_v8 = vpop.f32.mrb[47].mxu0  ;;  %1860 = vmatmul.mubr.bf16.gmra.mrb[104].mxu0 %v942_v49  ;;  %v848_v9 = vmax.f32 %v746_v0, 0.0  ;;  %v750_v10 = vadd.f32 %v749_v7, %v3371_v50  ;;  %v751_v12 = vpop.f32.mrb[47].mxu1  ;;  %1957 = vmatmul.mubr.bf16.gmra.mrb[104].mxu1 %v944_v52  ;;  %v846_v13 = vmax.f32 %v633_v57, 0.0 }
 0x144   :  { %v639_v11 = vadd.f32 %v638_v8, %v3367_v22  ;;  %v849_v14 = vmax.f32 %v748_v5, 0.0  ;;  %v752_v17 = vadd.f32 %v751_v12, %v3374_v60  ;;  %v847_v18 = vmax.f32 %v635_v1, 0.0 }
 0x145   :  { %v854_v15 = vmax.f32 %v637_v6, 0.0  ;;  %v856_v19 = vmax.f32 %v750_v10, 0.0 }
 0x146   :  { %v855_v20 = vmax.f32 %v639_v11, 0.0  ;;  %v857_v58 = vmax.f32 %v752_v17, 0.0 }
 0x147   :  { %v950_v21 = vpack.c.bf16 %v854_v15, %v846_v13  ;;  %v952_v23 = vpack.c.bf16 %v856_v19, %v848_v9 }
 0x148   :  { %v951_v24 = vpack.c.bf16 %v855_v20, %v847_v18  ;;  %v642_v25 = vpop.f32.mrb[48].mxu0  ;;  %v953_v26 = vpack.c.bf16 %v857_v58, %v849_v14  ;;  %v755_v28 = vpop.f32.mrb[48].mxu1 }
 0x149   :  { %v643_v27 = vadd.f32 %v642_v25, %v3361_v16  ;;  %v644_v29 = vpop.f32.mrb[49].mxu0  ;;  %v756_v59 = vadd.f32 %v755_v28, %v3371_v50  ;;  %v757_v31 = vpop.f32.mrb[49].mxu1 }
 0x14a   :  { %v645_v30 = vadd.f32 %v644_v29, %v3367_v22  ;;  %v646_v32 = vpop.f32.mrb[50].mxu0  ;;  %1867 = vmatprep.mubr.bf16.mxu0 %v951_v24  ;;  %v758_v33 = vadd.f32 %v757_v31, %v3374_v60  ;;  %v759_v35 = vpop.f32.mrb[50].mxu1  ;;  %1964 = vmatprep.mubr.bf16.mxu1 %v953_v26 }
 0x14b   :  { %v647_v34 = vadd.f32 %v646_v32, %v3361_v16  ;;  %v648_v36 = vpop.f32.mrb[51].mxu0  ;;  %1868 = vmatmul.mubr.bf16.gmra.mrb[108].mxu0 %v950_v21  ;;  %v864_v61 = vmax.f32 %v756_v59, 0.0  ;;  %v760_v37 = vadd.f32 %v759_v35, %v3371_v50  ;;  %v761_v39 = vpop.f32.mrb[51].mxu1  ;;  %1965 = vmatmul.mubr.bf16.gmra.mrb[108].mxu1 %v952_v23  ;;  %v862_v40 = vmax.f32 %v643_v27, 0.0 }
 0x14c   :  { %v649_v38 = vadd.f32 %v648_v36, %v3367_v22  ;;  %v865_v53 = vmax.f32 %v758_v33, 0.0  ;;  %v762_v42 = vadd.f32 %v761_v39, %v3374_v60  ;;  %v863_v43 = vmax.f32 %v645_v30, 0.0 }
 0x14d   :  { %v870_v41 = vmax.f32 %v647_v34, 0.0  ;;  %v872_v44 = vmax.f32 %v760_v37, 0.0 }
 0x14e   :  { %v871_v45 = vmax.f32 %v649_v38, 0.0  ;;  %v873_v46 = vmax.f32 %v762_v42, 0.0 }
 0x14f   :  { %v958_v3 = vpack.c.bf16 %v870_v41, %v862_v40  ;;  %v960_v47 = vpack.c.bf16 %v872_v44, %v864_v61 }
 0x150   :  { %v959_v48 = vpack.c.bf16 %v871_v45, %v863_v43  ;;  %v652_v49 = vpop.f32.mrb[52].mxu0  ;;  %v961_v51 = vpack.c.bf16 %v873_v46, %v865_v53  ;;  %v765_v54 = vpop.f32.mrb[52].mxu1 }
 0x151   :  { %v653_v52 = vadd.f32 %v652_v49, %v3361_v16  ;;  %v654_v55 = vpop.f32.mrb[53].mxu0  ;;  %v766_v56 = vadd.f32 %v765_v54, %v3371_v50  ;;  %v767_v62 = vpop.f32.mrb[53].mxu1 }
 0x152   :  { %v655_v57 = vadd.f32 %v654_v55, %v3367_v22  ;;  %v656_v63 = vpop.f32.mrb[54].mxu0  ;;  %1875 = vmatprep.mubr.bf16.mxu0 %v959_v48  ;;  %v768_v0 = vadd.f32 %v767_v62, %v3374_v60  ;;  %v769_v2 = vpop.f32.mrb[54].mxu1  ;;  %1972 = vmatprep.mubr.bf16.mxu1 %v961_v51 }
 0x153   :  { %v657_v1 = vadd.f32 %v656_v63, %v3361_v16  ;;  %v658_v4 = vpop.f32.mrb[55].mxu0  ;;  %1876 = vmatmul.mubr.bf16.gmra.mrb[112].mxu0 %v958_v3  ;;  %v880_v5 = vmax.f32 %v766_v56, 0.0  ;;  %v770_v6 = vadd.f32 %v769_v2, %v3371_v50  ;;  %v771_v8 = vpop.f32.mrb[55].mxu1  ;;  %1973 = vmatmul.mubr.bf16.gmra.mrb[112].mxu1 %v960_v47  ;;  %v878_v9 = vmax.f32 %v653_v52, 0.0 }
 0x154   :  { %v659_v7 = vadd.f32 %v658_v4, %v3367_v22  ;;  %v881_v10 = vmax.f32 %v768_v0, 0.0  ;;  %v772_v12 = vadd.f32 %v771_v8, %v3374_v60  ;;  %v879_v13 = vmax.f32 %v655_v57, 0.0 }
 0x155   :  { %v886_v11 = vmax.f32 %v657_v1, 0.0  ;;  %v888_v14 = vmax.f32 %v770_v6, 0.0 }
 0x156   :  { %v887_v15 = vmax.f32 %v659_v7, 0.0  ;;  %v889_v18 = vmax.f32 %v772_v12, 0.0 }
 0x157   :  { %v966_v17 = vpack.c.bf16 %v886_v11, %v878_v9  ;;  %v968_v19 = vpack.c.bf16 %v888_v14, %v880_v5 }
 0x158   :  { %v967_v20 = vpack.c.bf16 %v887_v15, %v879_v13  ;;  %v662_v21 = vpop.f32.mrb[56].mxu0  ;;  %v969_v58 = vpack.c.bf16 %v889_v18, %v881_v10  ;;  %v775_v24 = vpop.f32.mrb[56].mxu1 }
 0x159   :  { %v663_v23 = vadd.f32 %v662_v21, %v3361_v16  ;;  %v664_v25 = vpop.f32.mrb[57].mxu0  ;;  %v776_v26 = vadd.f32 %v775_v24, %v3371_v50  ;;  %v777_v28 = vpop.f32.mrb[57].mxu1 }
 0x15a   :  { %v665_v27 = vadd.f32 %v664_v25, %v3367_v22  ;;  %v666_v29 = vpop.f32.mrb[58].mxu0  ;;  %1883 = vmatprep.mubr.bf16.mxu0 %v967_v20  ;;  %v778_v59 = vadd.f32 %v777_v28, %v3374_v60  ;;  %v779_v31 = vpop.f32.mrb[58].mxu1  ;;  %1980 = vmatprep.mubr.bf16.mxu1 %v969_v58 }
 0x15b   :  { %v667_v30 = vadd.f32 %v666_v29, %v3361_v16  ;;  %v668_v32 = vpop.f32.mrb[59].mxu0  ;;  %1884 = vmatmul.mubr.bf16.gmra.mrb[116].mxu0 %v966_v17  ;;  %v896_v33 = vmax.f32 %v776_v26, 0.0  ;;  %v780_v34 = vadd.f32 %v779_v31, %v3371_v50  ;;  %v781_v36 = vpop.f32.mrb[59].mxu1  ;;  %1981 = vmatmul.mubr.bf16.gmra.mrb[116].mxu1 %v968_v19  ;;  %v894_v61 = vmax.f32 %v663_v23, 0.0 }
 0x15c   :  { %v669_v35 = vadd.f32 %v668_v32, %v3367_v22  ;;  %v897_v37 = vmax.f32 %v778_v59, 0.0  ;;  %v782_v39 = vadd.f32 %v781_v36, %v3374_v60  ;;  %v895_v40 = vmax.f32 %v665_v27, 0.0  ;;  %v1144_v19 = vpop.permute.xlu1 %1143 }
 0x15d   :  { %v902_v38 = vmax.f32 %v667_v30, 0.0  ;;  %v904_v53 = vmax.f32 %v780_v34, 0.0 }
 0x15e   :  { %v903_v41 = vmax.f32 %v669_v35, 0.0  ;;  %v905_v43 = vmax.f32 %v782_v39, 0.0 }
 0x15f   :  { %v974_v42 = vpack.c.bf16 %v902_v38, %v894_v61  ;;  %v976_v44 = vpack.c.bf16 %v904_v53, %v896_v33 }
 0x160   :  { %v975_v45 = vpack.c.bf16 %v903_v41, %v895_v40  ;;  %v672_v3 = vpop.f32.mrb[60].mxu0  ;;  %v977_v46 = vpack.c.bf16 %v905_v43, %v897_v37  ;;  %v785_v48 = vpop.f32.mrb[60].mxu1 }
 0x161   :  { %v673_v47 = vadd.f32 %v672_v3, %v3361_v16  ;;  %v674_v49 = vpop.f32.mrb[61].mxu0  ;;  %v786_v51 = vadd.f32 %v785_v48, %v3371_v50  ;;  %v787_v54 = vpop.f32.mrb[61].mxu1 }
 0x162   :  { %v675_v52 = vadd.f32 %v674_v49, %v3367_v22  ;;  %v676_v55 = vpop.f32.mrb[62].mxu0  ;;  %1891 = vmatprep.mubr.bf16.mxu0 %v975_v45  ;;  %v788_v56 = vadd.f32 %v787_v54, %v3374_v60  ;;  %v789_v62 = vpop.f32.mrb[62].mxu1  ;;  %1988 = vmatprep.mubr.bf16.mxu1 %v977_v46 }
 0x163   :  { %v677_v57 = vadd.f32 %v676_v55, %v3361_v16  ;;  %v678_v63 = vpop.f32.mrb[63].mxu0  ;;  %1892 = vmatmul.mubr.bf16.gmra.mrb[120].mxu0 %v974_v42  ;;  %v912_v0 = vmax.f32 %v786_v51, 0.0  ;;  %v790_v1 = vadd.f32 %v789_v62, %v3371_v50  ;;  %v791_v4 = vpop.f32.mrb[63].mxu1  ;;  %1989 = vmatmul.mubr.bf16.gmra.mrb[120].mxu1 %v976_v44  ;;  %v910_v5 = vmax.f32 %v673_v47, 0.0  ;;  %v3443_v50 = vld [vmem:[%s3759_s4] ss:$0 sm:$0xff] }
 0x164   :  { %v679_v2 = vadd.f32 %v678_v63, %v3367_v22  ;;  %v913_v6 = vmax.f32 %v788_v56, 0.0  ;;  %v792_v8 = vadd.f32 %v791_v4, %v3374_v60  ;;  %v911_v9 = vmax.f32 %v675_v52, 0.0  ;;  %v1134_v22 = vpop.permute.xlu0 %1133  ;;  %v1149_v34 = vpop.permute.xlu1 %1148 }
 0x165   :  { %v918_v7 = vmax.f32 %v677_v57, 0.0  ;;  %v920_v10 = vmax.f32 %v790_v1, 0.0  ;;  %v1217_v60 = vmul.f32 %v3443_v50, %v1134_v22  ;;  %v1219_v36 = vmul.f32 %v3443_v50, %v1144_v19 }
 0x166   :  { %v919_v11 = vmax.f32 %v679_v2, 0.0  ;;  %v921_v12 = vmax.f32 %v792_v8, 0.0  ;;  %v1220_v41 = vmul.f32 %v3443_v50, %v1149_v34 }
 0x167   :  { %v982_v16 = vpack.c.bf16 %v918_v7, %v910_v5  ;;  %v984_v13 = vpack.c.bf16 %v920_v10, %v912_v0 }
 0x168   :  { %v983_v14 = vpack.c.bf16 %v919_v11, %v911_v9  ;;  %v985_v15 = vpack.c.bf16 %v921_v12, %v913_v6  ;;  %v1139_v17 = vpop.permute.xlu0 %1138  ;;  %v1159_v52 = vpop.permute.xlu1 %1158 }
 0x169   :  { %v1218_v25 = vmul.f32 %v3443_v50, %v1139_v17  ;;  %v1222_v2 = vmul.f32 %v3443_v50, %v1159_v52 }
 0x16a   :  { %1899 = vmatprep.mubr.bf16.mxu0 %v983_v14  ;;  %1996 = vmatprep.mubr.bf16.mxu1 %v985_v15 }
 0x16b   :  { %1900 = vmatmul.mubr.bf16.gmra.mrb[124].mxu0 %v982_v16  ;;  %1997 = vmatmul.mubr.bf16.gmra.mrb[124].mxu1 %v984_v13 }
 0x16c   :  { %v1154_v48 = vpop.permute.xlu0 %1153  ;;  %v1169_v13 = vpop.permute.xlu1 %1168 }
 0x16d   :  { %v1221_v56 = vmul.f32 %v3443_v50, %v1154_v48 }
 0x170   :  { %v1164_v11 = vpop.permute.xlu0 %1163 }
 0x171   :  { %v1223_v22 = vmul.f32 %v3443_v50, %v1164_v11 }
 0x1c6   :  { %v2379_v18 = vpop.f32.mrb[64].mxu0  ;;  %v2443_v20 = vpop.f32.mrb[64].mxu1 }
 0x1c7   :  { %v2380_v21 = vpop.f32.mrb[65].mxu0  ;;  %v2444_v23 = vpop.f32.mrb[65].mxu1 }
 0x1c8   :  { %v2381_v58 = vadd.f32 %v2380_v21, %v2379_v18  ;;  %v2382_v24 = vpop.f32.mrb[66].mxu0  ;;  %v2445_v26 = vadd.f32 %v2444_v23, %v2443_v20  ;;  %v2446_v27 = vpop.f32.mrb[66].mxu1  ;;  %v1224_v21 = vmul.f32 %v3443_v50, %v1169_v13 }
 0x1c9   :  { %v2383_v28 = vpop.f32.mrb[67].mxu0  ;;  %v2447_v30 = vpop.f32.mrb[67].mxu1 }
 0x1ca   :  { %v1652_v29 = vadd.f32 %v2381_v58, %v1217_v60  ;;  %v2384_v59 = vadd.f32 %v2383_v28, %v2382_v24  ;;  %v2448_v31 = vadd.f32 %v2447_v30, %v2446_v27 }
 0x1cc   :  { %v3447_v32 = vadd.f32 %v2445_v26, %v1652_v29  ;;  %v1655_v33 = vadd.f32 %v2384_v59, %v1218_v25  ;;  %v1174_v29 = vpop.permute.xlu0 %1173 }
 0x1ce   :  { %v3449_v35 = vadd.f32 %v2448_v31, %v1655_v33  ;;  %v2385_v61 = vpop.f32.mrb[68].mxu0  ;;  %v2449_v37 = vpop.f32.mrb[68].mxu1 }
 0x1cf   :  { %v2386_v38 = vpop.f32.mrb[69].mxu0  ;;  %v2450_v40 = vpop.f32.mrb[69].mxu1 }
 0x1d0   :  { %v2387_v39 = vadd.f32 %v2386_v38, %v2385_v61  ;;  %v2388_v53 = vpop.f32.mrb[70].mxu0  ;;  %v2451_v42 = vadd.f32 %v2450_v40, %v2449_v37  ;;  %v2452_v43 = vpop.f32.mrb[70].mxu1 }
 0x1d1   :  { %v2389_v44 = vpop.f32.mrb[71].mxu0  ;;  %v2453_v46 = vpop.f32.mrb[71].mxu1 }
 0x1d2   :  { %v1660_v45 = vadd.f32 %v2387_v39, %v1219_v36  ;;  %v2390_v3 = vadd.f32 %v2389_v44, %v2388_v53  ;;  %v2454_v47 = vadd.f32 %v2453_v46, %v2452_v43  ;;  %v1179_v31 = vpop.permute.xlu1 %1178  ;;  %v1225_v36 = vmul.f32 %v3443_v50, %v1174_v29 }
 0x1d3   :  { %v1226_v53 = vmul.f32 %v3443_v50, %v1179_v31 }
 0x1d4   :  { %v3453_v49 = vadd.f32 %v2451_v42, %v1660_v45  ;;  %v1663_v51 = vadd.f32 %v2390_v3, %v1220_v41 }
 0x1d6   :  { %v3455_v54 = vadd.f32 %v2454_v47, %v1663_v51  ;;  %v2391_v55 = vpop.f32.mrb[72].mxu0  ;;  %v2455_v57 = vpop.f32.mrb[72].mxu1 }
 0x1d7   :  { %v2392_v62 = vpop.f32.mrb[73].mxu0  ;;  %v2456_v0 = vpop.f32.mrb[73].mxu1 }
 0x1d8   :  { %v2393_v63 = vadd.f32 %v2392_v62, %v2391_v55  ;;  %v2394_v1 = vpop.f32.mrb[74].mxu0  ;;  %v2457_v4 = vadd.f32 %v2456_v0, %v2455_v57  ;;  %v2458_v5 = vpop.f32.mrb[74].mxu1 }
 0x1d9   :  { %v2395_v6 = vpop.f32.mrb[75].mxu0  ;;  %v2459_v9 = vpop.f32.mrb[75].mxu1 }
 0x1da   :  { %v1668_v7 = vadd.f32 %v2393_v63, %v1221_v56  ;;  %v2396_v8 = vadd.f32 %v2395_v6, %v2394_v1  ;;  %v2460_v10 = vadd.f32 %v2459_v9, %v2458_v5  ;;  %v1184_v47 = vpop.permute.xlu0 %1183  ;;  %v1189_v52 = vpop.permute.xlu1 %1188 }
 0x1db   :  { %v1227_v57 = vmul.f32 %v3443_v50, %v1184_v47 }
 0x1dc   :  { %v3459_v16 = vadd.f32 %v2457_v4, %v1668_v7  ;;  %v1671_v12 = vadd.f32 %v2396_v8, %v1222_v2  ;;  %v1228_v4 = vmul.f32 %v3443_v50, %v1189_v52 }
 0x1de   :  { %v3461_v14 = vadd.f32 %v2460_v10, %v1671_v12  ;;  %v2397_v15 = vpop.f32.mrb[76].mxu0  ;;  %v2461_v17 = vpop.f32.mrb[76].mxu1 }
 0x1df   :  { %v2398_v60 = vpop.f32.mrb[77].mxu0  ;;  %v2462_v19 = vpop.f32.mrb[77].mxu1 }
 0x1e0   :  { %v2399_v18 = vadd.f32 %v2398_v60, %v2397_v15  ;;  %v2400_v20 = vpop.f32.mrb[78].mxu0  ;;  %v2463_v58 = vadd.f32 %v2462_v19, %v2461_v17  ;;  %v2464_v23 = vpop.f32.mrb[78].mxu1 }
 0x1e1   :  { %v2401_v24 = vpop.f32.mrb[79].mxu0  ;;  %v2465_v27 = vpop.f32.mrb[79].mxu1 }
 0x1e2   :  { %v1676_v25 = vadd.f32 %v2399_v18, %v1223_v22  ;;  %v2402_v26 = vadd.f32 %v2401_v24, %v2400_v20  ;;  %v2466_v28 = vadd.f32 %v2465_v27, %v2464_v23  ;;  %v1194_v12 = vpop.permute.xlu0 %1193  ;;  %v1199_v22 = vpop.permute.xlu1 %1198 }
 0x1e3   :  { %v1229_v18 = vmul.f32 %v3443_v50, %v1194_v12  ;;  %v1230_v24 = vmul.f32 %v3443_v50, %v1199_v22  ;;  %v3497_v22 = vld [vmem:[%s3760_s5] ss:$0 sm:$0xff] }
 0x1e4   :  { %v3465_v59 = vadd.f32 %v2463_v58, %v1676_v25  ;;  %v1679_v30 = vadd.f32 %v2402_v26, %v1224_v21 }
 0x1e6   :  { %v3467_v33 = vadd.f32 %v2466_v28, %v1679_v30  ;;  %v2403_v34 = vpop.f32.mrb[80].mxu0  ;;  %v2467_v61 = vpop.f32.mrb[80].mxu1 }
 0x1e7   :  { %v2404_v37 = vpop.f32.mrb[81].mxu0  ;;  %v2468_v39 = vpop.f32.mrb[81].mxu1 }
 0x1e8   :  { %v2405_v38 = vadd.f32 %v2404_v37, %v2403_v34  ;;  %v2406_v40 = vpop.f32.mrb[82].mxu0  ;;  %v2469_v41 = vadd.f32 %v2468_v39, %v2467_v61  ;;  %v2470_v42 = vpop.f32.mrb[82].mxu1 }
 0x1e9   :  { %v2407_v43 = vpop.f32.mrb[83].mxu0  ;;  %v2471_v3 = vpop.f32.mrb[83].mxu1 }
 0x1ea   :  { %v1684_v44 = vadd.f32 %v2405_v38, %v1225_v36  ;;  %v2408_v45 = vadd.f32 %v2407_v43, %v2406_v40  ;;  %v2472_v46 = vadd.f32 %v2471_v3, %v2470_v42  ;;  %v1204_v34 = vpop.permute.xlu0 %1203  ;;  %v1209_v37 = vpop.permute.xlu1 %1208 }
 0x1eb   :  { %v1231_v40 = vmul.f32 %v3443_v50, %v1204_v34 }
 0x1ec   :  { %v3471_v48 = vadd.f32 %v2469_v41, %v1684_v44  ;;  %v1687_v51 = vadd.f32 %v2408_v45, %v1226_v53  ;;  %v1232_v45 = vmul.f32 %v3443_v50, %v1209_v37 }
 0x1ee   :  { %v3473_v55 = vadd.f32 %v2472_v46, %v1687_v51  ;;  %v2409_v56 = vpop.f32.mrb[84].mxu0  ;;  %v2473_v62 = vpop.f32.mrb[84].mxu1 }
 0x1ef   :  { %v2410_v63 = vpop.f32.mrb[85].mxu0  ;;  %v2474_v1 = vpop.f32.mrb[85].mxu1 }
 0x1f0   :  { %v2411_v0 = vadd.f32 %v2410_v63, %v2409_v56  ;;  %v2412_v2 = vpop.f32.mrb[86].mxu0  ;;  %v2475_v5 = vadd.f32 %v2474_v1, %v2473_v62  ;;  %v2476_v6 = vpop.f32.mrb[86].mxu1 }
 0x1f1   :  { %v2413_v7 = vpop.f32.mrb[87].mxu0  ;;  %v2477_v10 = vpop.f32.mrb[87].mxu1 }
 0x1f2   :  { %v1692_v8 = vadd.f32 %v2411_v0, %v1227_v57  ;;  %v2414_v9 = vadd.f32 %v2413_v7, %v2412_v2  ;;  %v2478_v11 = vadd.f32 %v2477_v10, %v2476_v6 }
 0x1f4   :  { %v3477_v13 = vadd.f32 %v2475_v5, %v1692_v8  ;;  %v1695_v15 = vadd.f32 %v2414_v9, %v1228_v4 }
 0x1f6   :  { %v3479_v17 = vadd.f32 %v2478_v11, %v1695_v15  ;;  %v2415_v60 = vpop.f32.mrb[88].mxu0  ;;  %v2479_v19 = vpop.f32.mrb[88].mxu1 }
 0x1f7   :  { %v2416_v20 = vpop.f32.mrb[89].mxu0  ;;  %v2480_v58 = vpop.f32.mrb[89].mxu1 }
 0x1f8   :  { %v2417_v21 = vadd.f32 %v2416_v20, %v2415_v60  ;;  %v2418_v23 = vpop.f32.mrb[90].mxu0  ;;  %v2481_v25 = vadd.f32 %v2480_v58, %v2479_v19  ;;  %v2482_v26 = vpop.f32.mrb[90].mxu1 }
 0x1f9   :  { %v2419_v27 = vpop.f32.mrb[91].mxu0  ;;  %v2483_v30 = vpop.f32.mrb[91].mxu1 }
 0x1fa   :  { %v1700_v28 = vadd.f32 %v2417_v21, %v1229_v18  ;;  %v2420_v29 = vadd.f32 %v2419_v27, %v2418_v23  ;;  %v2484_v31 = vadd.f32 %v2483_v30, %v2482_v26 }
 0x1fc   :  { %v3483_v36 = vadd.f32 %v2481_v25, %v1700_v28  ;;  %v1703_v61 = vadd.f32 %v2420_v29, %v1230_v24 }
 0x1fe   :  { %v3485_v38 = vadd.f32 %v2484_v31, %v1703_v61  ;;  %v2421_v39 = vpop.f32.mrb[92].mxu0  ;;  %v2485_v53 = vpop.f32.mrb[92].mxu1 }
 0x1ff   :  { %v2422_v41 = vpop.f32.mrb[93].mxu0  ;;  %v2486_v43 = vpop.f32.mrb[93].mxu1 }
 0x200   :  { %v2423_v42 = vadd.f32 %v2422_v41, %v2421_v39  ;;  %v2424_v44 = vpop.f32.mrb[94].mxu0  ;;  %v2487_v3 = vadd.f32 %v2486_v43, %v2485_v53  ;;  %v2488_v46 = vpop.f32.mrb[94].mxu1 }
 0x201   :  { %v2425_v47 = vpop.f32.mrb[95].mxu0  ;;  %v2489_v56 = vpop.f32.mrb[95].mxu1 }
 0x202   :  { %v1708_v51 = vadd.f32 %v2423_v42, %v1231_v40  ;;  %v2426_v52 = vadd.f32 %v2425_v47, %v2424_v44  ;;  %v2490_v57 = vadd.f32 %v2489_v56, %v2488_v46 }
 0x204   :  { %v3489_v62 = vadd.f32 %v2487_v3, %v1708_v51  ;;  %v1711_v63 = vadd.f32 %v2426_v52, %v1232_v45 }
 0x206   :  { %v3491_v0 = vadd.f32 %v2490_v57, %v1711_v63  ;;  %v2507_v1 = vpop.f32.mrb[96].mxu0  ;;  %v2571_v2 = vpop.f32.mrb[96].mxu1 }
 0x207   :  { %v2508_v4 = vpop.f32.mrb[97].mxu0  ;;  %v2572_v6 = vpop.f32.mrb[97].mxu1 }
 0x208   :  { %v2509_v5 = vadd.f32 %v2508_v4, %v2507_v1  ;;  %v2510_v7 = vpop.f32.mrb[98].mxu0  ;;  %v2573_v8 = vadd.f32 %v2572_v6, %v2571_v2  ;;  %v2574_v50 = vpop.f32.mrb[98].mxu1 }
 0x209   :  { %v2511_v9 = vpop.f32.mrb[99].mxu0  ;;  %v2575_v12 = vpop.f32.mrb[99].mxu1 }
 0x20a   :  { %v1846_v10 = vadd.f32 %v2509_v5, %v3447_v32  ;;  %v2512_v11 = vadd.f32 %v2511_v9, %v2510_v7  ;;  %v2576_v15 = vadd.f32 %v2575_v12, %v2574_v50 }
 0x20c   :  { %v1943_v60 = vadd.f32 %v2573_v8, %v1846_v10  ;;  %v1849_v18 = vadd.f32 %v2512_v11, %v3449_v35 }
 0x20e   :  { %v1946_v19 = vadd.f32 %v2576_v15, %v1849_v18  ;;  %v2513_v20 = vpop.f32.mrb[100].mxu0  ;;  %v3501_v21 = vadd.f32 %v3497_v22, %v1943_v60  ;;  %v2577_v58 = vpop.f32.mrb[100].mxu1 }
 0x20f   :  { %v2514_v23 = vpop.f32.mrb[101].mxu0  ;;  %v2578_v24 = vpop.f32.mrb[101].mxu1 }
 0x210   :  { %v2515_v32 = vadd.f32 %v2514_v23, %v2513_v20  ;;  %v2516_v25 = vpop.f32.mrb[102].mxu0  ;;  %v2029_v26 = vsel %vm2028_vm1, %v3501_v21, -inf  ;;  %v3506_v27 = vadd.f32 %v3497_v22, %v1946_v19  ;;  %v2579_v28 = vadd.f32 %v2578_v24, %v2577_v58  ;;  %v2580_v29 = vpop.f32.mrb[102].mxu1 }
 0x211   :  { %v2517_v35 = vpop.f32.mrb[103].mxu0  ;;  %2030 = vmax.xlane.f32.xlu0 %v2029_v26  ;;  %v2581_v34 = vpop.f32.mrb[103].mxu1 }
 0x212   :  { %v1854_v30 = vadd.f32 %v2515_v32, %v3453_v49  ;;  %v2518_v31 = vadd.f32 %v2517_v35, %v2516_v25  ;;  %v2032_v61 = vsel %vm2028_vm1, %v3506_v27, -inf  ;;  %v2582_v37 = vadd.f32 %v2581_v34, %v2580_v29 }
 0x213   :  { %2033 = vmax.xlane.f32.xlu1 %v2032_v61 }
 0x214   :  { %v1951_v39 = vadd.f32 %v2579_v28, %v1854_v30  ;;  %v1857_v40 = vadd.f32 %v2518_v31, %v3455_v54 }
 0x216   :  { %v1954_v53 = vadd.f32 %v2582_v37, %v1857_v40  ;;  %v2519_v41 = vpop.f32.mrb[104].mxu0  ;;  %v3513_v42 = vadd.f32 %v3497_v22, %v1951_v39  ;;  %v2583_v43 = vpop.f32.mrb[104].mxu1 }
 0x217   :  { %v2520_v44 = vpop.f32.mrb[105].mxu0  ;;  %v2584_v3 = vpop.f32.mrb[105].mxu1 }
 0x218   :  { %v2521_v45 = vadd.f32 %v2520_v44, %v2519_v41  ;;  %v2522_v49 = vpop.f32.mrb[106].mxu0  ;;  %v2035_v46 = vsel %vm2028_vm1, %v3513_v42, -inf  ;;  %v3518_v47 = vadd.f32 %v3497_v22, %v1954_v53  ;;  %v2585_v51 = vadd.f32 %v2584_v3, %v2583_v43  ;;  %v2586_v52 = vpop.f32.mrb[106].mxu1 }
 0x219   :  { %v2523_v56 = vpop.f32.mrb[107].mxu0  ;;  %2036 = vmax.xlane.f32.xlu0 %v2035_v46  ;;  %v2587_v63 = vpop.f32.mrb[107].mxu1 }
 0x21a   :  { %v1862_v54 = vadd.f32 %v2521_v45, %v3459_v16  ;;  %v2524_v57 = vadd.f32 %v2523_v56, %v2522_v49  ;;  %v2588_v1 = vadd.f32 %v2587_v63, %v2586_v52  ;;  %v2038_v5 = vsel %vm2028_vm1, %v3518_v47, -inf }
 0x21c   :  { %v1959_v2 = vadd.f32 %v2585_v51, %v1862_v54  ;;  %v1865_v4 = vadd.f32 %v2524_v57, %v3461_v14 }
 0x21d   :  { %2039 = vmax.xlane.f32.xlu0 %v2038_v5 }
 0x21e   :  { %v1962_v6 = vadd.f32 %v2588_v1, %v1865_v4  ;;  %v2525_v7 = vpop.f32.mrb[108].mxu0  ;;  %v3525_v8 = vadd.f32 %v3497_v22, %v1959_v2  ;;  %v2589_v50 = vpop.f32.mrb[108].mxu1 }
 0x21f   :  { %v2526_v9 = vpop.f32.mrb[109].mxu0  ;;  %v2590_v11 = vpop.f32.mrb[109].mxu1 }
 0x220   :  { %v2527_v10 = vadd.f32 %v2526_v9, %v2525_v7  ;;  %v2528_v16 = vpop.f32.mrb[110].mxu0  ;;  %v2041_v12 = vsel %vm2028_vm1, %v3525_v8, -inf  ;;  %v3530_v15 = vadd.f32 %v3497_v22, %v1962_v6  ;;  %v2591_v14 = vadd.f32 %v2590_v11, %v2589_v50  ;;  %v2592_v60 = vpop.f32.mrb[110].mxu1 }
 0x221   :  { %v2529_v18 = vpop.f32.mrb[111].mxu0  ;;  %2042 = vmax.xlane.f32.xlu1 %v2041_v12  ;;  %v2593_v58 = vpop.f32.mrb[111].mxu1 }
 0x222   :  { %v1870_v19 = vadd.f32 %v2527_v10, %v3465_v59  ;;  %v2530_v20 = vadd.f32 %v2529_v18, %v2528_v16  ;;  %v2044_v23 = vsel %vm2028_vm1, %v3530_v15, -inf  ;;  %v2594_v32 = vadd.f32 %v2593_v58, %v2592_v60 }
 0x223   :  { %2045 = vmax.xlane.f32.xlu0 %v2044_v23 }
 0x224   :  { %v1967_v24 = vadd.f32 %v2591_v14, %v1870_v19  ;;  %v1873_v25 = vadd.f32 %v2530_v20, %v3467_v33 }
 0x226   :  { %v1970_v26 = vadd.f32 %v2594_v32, %v1873_v25  ;;  %v2531_v28 = vpop.f32.mrb[112].mxu0  ;;  %v3537_v29 = vadd.f32 %v3497_v22, %v1967_v24  ;;  %v2595_v35 = vpop.f32.mrb[112].mxu1 }
 0x227   :  { %v2532_v30 = vpop.f32.mrb[113].mxu0  ;;  %v2596_v34 = vpop.f32.mrb[113].mxu1 }
 0x228   :  { %v2533_v31 = vadd.f32 %v2532_v30, %v2531_v28  ;;  %v2534_v59 = vpop.f32.mrb[114].mxu0  ;;  %v2047_v61 = vsel %vm2028_vm1, %v3537_v29, -inf  ;;  %v3542_v37 = vadd.f32 %v3497_v22, %v1970_v26  ;;  %v2597_v39 = vadd.f32 %v2596_v34, %v2595_v35  ;;  %v2598_v40 = vpop.f32.mrb[114].mxu1 }
 0x229   :  { %v2535_v53 = vpop.f32.mrb[115].mxu0  ;;  %2048 = vmax.xlane.f32.xlu1 %v2047_v61  ;;  %v2599_v43 = vpop.f32.mrb[115].mxu1 }
 0x22a   :  { %v1878_v33 = vadd.f32 %v2533_v31, %v3471_v48  ;;  %v2536_v41 = vadd.f32 %v2535_v53, %v2534_v59  ;;  %v2050_v44 = vsel %vm2028_vm1, %v3542_v37, -inf  ;;  %v2600_v45 = vadd.f32 %v2599_v43, %v2598_v40 }
 0x22b   :  { %2051 = vmax.xlane.f32.xlu0 %v2050_v44 }
 0x22c   :  { %v1975_v3 = vadd.f32 %v2597_v39, %v1878_v33  ;;  %v1881_v49 = vadd.f32 %v2536_v41, %v3473_v55 }
 0x22e   :  { %v1978_v46 = vadd.f32 %v2600_v45, %v1881_v49  ;;  %v2537_v51 = vpop.f32.mrb[116].mxu0  ;;  %v3549_v52 = vadd.f32 %v3497_v22, %v1975_v3  ;;  %v2601_v56 = vpop.f32.mrb[116].mxu1 }
 0x22f   :  { %v2538_v54 = vpop.f32.mrb[117].mxu0  ;;  %v2602_v63 = vpop.f32.mrb[117].mxu1 }
 0x230   :  { %v2539_v57 = vadd.f32 %v2538_v54, %v2537_v51  ;;  %v2540_v48 = vpop.f32.mrb[118].mxu0  ;;  %v2053_v1 = vsel %vm2028_vm1, %v3549_v52, -inf  ;;  %v3554_v2 = vadd.f32 %v3497_v22, %v1978_v46  ;;  %v2603_v4 = vadd.f32 %v2602_v63, %v2601_v56  ;;  %v2604_v5 = vpop.f32.mrb[118].mxu1 }
 0x231   :  { %v2541_v6 = vpop.f32.mrb[119].mxu0  ;;  %2054 = vmax.xlane.f32.xlu1 %v2053_v1  ;;  %v2605_v50 = vpop.f32.mrb[119].mxu1 }
 0x232   :  { %v1886_v55 = vadd.f32 %v2539_v57, %v3477_v13  ;;  %v2542_v7 = vadd.f32 %v2541_v6, %v2540_v48  ;;  %v2056_v9 = vsel %vm2028_vm1, %v3554_v2, -inf  ;;  %v2606_v10 = vadd.f32 %v2605_v50, %v2604_v5 }
 0x233   :  { %2057 = vmax.xlane.f32.xlu0 %v2056_v9 }
 0x234   :  { %v1983_v11 = vadd.f32 %v2603_v4, %v1886_v55  ;;  %v1889_v16 = vadd.f32 %v2542_v7, %v3479_v17 }
 0x236   :  { %v1986_v12 = vadd.f32 %v2606_v10, %v1889_v16  ;;  %v2543_v14 = vpop.f32.mrb[120].mxu0  ;;  %v3561_v60 = vadd.f32 %v3497_v22, %v1983_v11  ;;  %v2607_v18 = vpop.f32.mrb[120].mxu1 }
 0x237   :  { %v2544_v19 = vpop.f32.mrb[121].mxu0  ;;  %v2608_v58 = vpop.f32.mrb[121].mxu1 }
 0x238   :  { %v2545_v20 = vadd.f32 %v2544_v19, %v2543_v14  ;;  %v2546_v13 = vpop.f32.mrb[122].mxu0  ;;  %v2059_v23 = vsel %vm2028_vm1, %v3561_v60, -inf  ;;  %v3566_v32 = vadd.f32 %v3497_v22, %v1986_v12  ;;  %v2609_v24 = vadd.f32 %v2608_v58, %v2607_v18  ;;  %v2610_v25 = vpop.f32.mrb[122].mxu1 }
 0x239   :  { %v2547_v26 = vpop.f32.mrb[123].mxu0  ;;  %2060 = vmax.xlane.f32.xlu1 %v2059_v23  ;;  %v2611_v35 = vpop.f32.mrb[123].mxu1 }
 0x23a   :  { %v1894_v17 = vadd.f32 %v2545_v20, %v3483_v36  ;;  %v2548_v28 = vadd.f32 %v2547_v26, %v2546_v13  ;;  %v2062_v30 = vsel %vm2028_vm1, %v3566_v32, -inf  ;;  %v2612_v31 = vadd.f32 %v2611_v35, %v2610_v25 }
 0x23b   :  { %2063 = vmax.xlane.f32.xlu0 %v2062_v30 }
 0x23c   :  { %v1991_v34 = vadd.f32 %v2609_v24, %v1894_v17  ;;  %v1897_v59 = vadd.f32 %v2548_v28, %v3485_v38 }
 0x23e   :  { %v1994_v61 = vadd.f32 %v2612_v31, %v1897_v59  ;;  %v2549_v39 = vpop.f32.mrb[124].mxu0  ;;  %v3573_v40 = vadd.f32 %v3497_v22, %v1991_v34  ;;  %v2613_v53 = vpop.f32.mrb[124].mxu1 }
 0x23f   :  { %v2550_v33 = vpop.f32.mrb[125].mxu0  ;;  %v2614_v43 = vpop.f32.mrb[125].mxu1 }
 0x240   :  { %v2551_v41 = vadd.f32 %v2550_v33, %v2549_v39  ;;  %v2552_v36 = vpop.f32.mrb[126].mxu0  ;;  %v2065_v44 = vsel %vm2028_vm1, %v3573_v40, -inf  ;;  %v3578_v45 = vadd.f32 %v3497_v22, %v1994_v61  ;;  %v2615_v3 = vadd.f32 %v2614_v43, %v2613_v53  ;;  %v2616_v49 = vpop.f32.mrb[126].mxu1 }
 0x241   :  { %v2553_v46 = vpop.f32.mrb[127].mxu0  ;;  %2066 = vmax.xlane.f32.xlu1 %v2065_v44  ;;  %v2617_v56 = vpop.f32.mrb[127].mxu1 }
 0x242   :  { %v1902_v38 = vadd.f32 %v2551_v41, %v3489_v62  ;;  %v2554_v51 = vadd.f32 %v2553_v46, %v2552_v36  ;;  %v2068_v54 = vsel %vm2028_vm1, %v3578_v45, -inf  ;;  %v2618_v57 = vadd.f32 %v2617_v56, %v2616_v49 }
 0x243   :  { %2069 = vmax.xlane.f32.xlu0 %v2068_v54 }
 0x244   :  { %v1999_v63 = vadd.f32 %v2615_v3, %v1902_v38  ;;  %v1905_v48 = vadd.f32 %v2554_v51, %v3491_v0 }
 0x246   :  { %v2002_v1 = vadd.f32 %v2618_v57, %v1905_v48  ;;  %v3585_v4 = vadd.f32 %v3497_v22, %v1999_v63 }
 0x248   :  { %v2071_v5 = vsel %vm2028_vm1, %v3585_v4, -inf  ;;  %v3590_v6 = vadd.f32 %v3497_v22, %v2002_v1 }
 0x249   :  { %2072 = vmax.xlane.f32.xlu1 %v2071_v5 }
 0x24a   :  { %v2074_v62 = vsel %vm2028_vm1, %v3590_v6, -inf }
 0x24b   :  { %2075 = vmax.xlane.f32.xlu0 %v2074_v62 }
 0x29e   :  { %v2031_v55 = vpop.xlane.xlu0 %2030 }
 0x29f   :  { %v2077_v7 = vsub.f32 %v3501_v21, %v2031_v55 }
 0x2a0   :  { %v2034_v50 = vpop.xlane.xlu1 %2033 }
 0x2a1   :  { %v2093_v0 = vmul.f32 1.442695, %v2077_v7  ;;  %v2078_v9 = vsub.f32 %v3506_v27, %v2034_v50 }
 0x2a3   :  { %2694 = vpow2.f32 %v2093_v0  ;;  %v2095_v10 = vmul.f32 1.442695, %v2078_v9 }
 0x2a5   :  { %2696 = vpow2.f32 %v2095_v10 }
 0x2a6   :  { %v2037_v11 = vpop.xlane.xlu0 %2036 }
 0x2a7   :  { %v2079_v16 = vsub.f32 %v3513_v42, %v2037_v11 }
 0x2a9   :  { %v2097_v22 = vmul.f32 1.442695, %v2079_v16 }
 0x2aa   :  { %v2040_v12 = vpop.xlane.xlu0 %2039 }
 0x2ab   :  { %2698 = vpow2.f32 %v2097_v22  ;;  %v2080_v14 = vsub.f32 %v3518_v47, %v2040_v12 }
 0x2ad   :  { %v3598_v18 = vpop.eup %2694  ;;  %v2099_v19 = vmul.f32 1.442695, %v2080_v14 }
 0x2ae   :  { %v2043_v20 = vpop.xlane.xlu1 %2042  ;;  %v2125_v21 = vsel %vm2028_vm1, %v3598_v18, 0.0 }
 0x2af   :  { %v3602_v58 = vpop.eup %2696  ;;  %2700 = vpow2.f32 %v2099_v19  ;;  %v2081_v27 = vsub.f32 %v3525_v8, %v2043_v20  ;;  %2126 = vadd.xlane.f32.xlu1 %v2125_v21 }
 0x2b0   :  { %v2046_v13 = vpop.xlane.xlu0 %2045  ;;  %v2128_v42 = vsel %vm2028_vm1, %v3602_v58, 0.0 }
 0x2b1   :  { %v2101_v23 = vmul.f32 1.442695, %v2081_v27  ;;  %v2082_v47 = vsub.f32 %v3530_v15, %v2046_v13  ;;  %2129 = vadd.xlane.f32.xlu0 %v2128_v42 }
 0x2b3   :  { %2702 = vpow2.f32 %v2101_v23  ;;  %v2103_v24 = vmul.f32 1.442695, %v2082_v47 }
 0x2b5   :  { %v3608_v25 = vpop.eup %2698  ;;  %2704 = vpow2.f32 %v2103_v24 }
 0x2b6   :  { %v2049_v26 = vpop.xlane.xlu1 %2048  ;;  %v2131_v17 = vsel %vm2028_vm1, %v3608_v25, 0.0 }
 0x2b7   :  { %v2083_v8 = vsub.f32 %v3537_v29, %v2049_v26  ;;  %2132 = vadd.xlane.f32.xlu1 %v2131_v17 }
 0x2b8   :  { %v2052_v28 = vpop.xlane.xlu0 %2051 }
 0x2b9   :  { %v3613_v35 = vpop.eup %2700  ;;  %v2105_v30 = vmul.f32 1.442695, %v2083_v8  ;;  %v2084_v31 = vsub.f32 %v3542_v37, %v2052_v28 }
 0x2ba   :  { %v2134_v15 = vsel %vm2028_vm1, %v3613_v35, 0.0 }
 0x2bb   :  { %2706 = vpow2.f32 %v2105_v30  ;;  %v2107_v34 = vmul.f32 1.442695, %v2084_v31  ;;  %2135 = vadd.xlane.f32.xlu0 %v2134_v15 }
 0x2bd   :  { %v3618_v59 = vpop.eup %2702  ;;  %2708 = vpow2.f32 %v2107_v34 }
 0x2be   :  { %v2055_v61 = vpop.xlane.xlu1 %2054  ;;  %v2137_v29 = vsel %vm2028_vm1, %v3618_v59, 0.0 }
 0x2bf   :  { %v3622_v39 = vpop.eup %2704  ;;  %v2085_v53 = vsub.f32 %v3549_v52, %v2055_v61  ;;  %2138 = vadd.xlane.f32.xlu1 %v2137_v29 }
 0x2c0   :  { %v2058_v33 = vpop.xlane.xlu0 %2057  ;;  %v2140_v37 = vsel %vm2028_vm1, %v3622_v39, 0.0 }
 0x2c1   :  { %v2109_v41 = vmul.f32 1.442695, %v2085_v53  ;;  %v2086_v43 = vsub.f32 %v3554_v2, %v2058_v33  ;;  %2141 = vadd.xlane.f32.xlu0 %v2140_v37 }
 0x2c3   :  { %2710 = vpow2.f32 %v2109_v41  ;;  %v2111_v36 = vmul.f32 1.442695, %v2086_v43 }
 0x2c5   :  { %v3628_v44 = vpop.eup %2706  ;;  %2712 = vpow2.f32 %v2111_v36 }
 0x2c6   :  { %v2061_v3 = vpop.xlane.xlu1 %2060  ;;  %v2143_v49 = vsel %vm2028_vm1, %v3628_v44, 0.0 }
 0x2c7   :  { %v3632_v46 = vpop.eup %2708  ;;  %v2087_v52 = vsub.f32 %v3561_v60, %v2061_v3  ;;  %2144 = vadd.xlane.f32.xlu1 %v2143_v49 }
 0x2c8   :  { %v2064_v38 = vpop.xlane.xlu0 %2063  ;;  %v2146_v51 = vsel %vm2028_vm1, %v3632_v46, 0.0 }
 0x2c9   :  { %v2113_v2 = vmul.f32 1.442695, %v2087_v52  ;;  %v2088_v56 = vsub.f32 %v3566_v32, %v2064_v38  ;;  %2147 = vadd.xlane.f32.xlu0 %v2146_v51 }
 0x2cb   :  { %2714 = vpow2.f32 %v2113_v2  ;;  %v2115_v54 = vmul.f32 1.442695, %v2088_v56 }
 0x2cd   :  { %v3638_v57 = vpop.eup %2710  ;;  %2716 = vpow2.f32 %v2115_v54 }
 0x2ce   :  { %v2067_v63 = vpop.xlane.xlu1 %2066  ;;  %v2149_v48 = vsel %vm2028_vm1, %v3638_v57, 0.0 }
 0x2cf   :  { %v3642_v1 = vpop.eup %2712  ;;  %v2089_v60 = vsub.f32 %v3573_v40, %v2067_v63  ;;  %2150 = vadd.xlane.f32.xlu1 %v2149_v48 }
 0x2d0   :  { %v2070_v5 = vpop.xlane.xlu0 %2069  ;;  %v2152_v62 = vsel %vm2028_vm1, %v3642_v1, 0.0 }
 0x2d1   :  { %v2117_v32 = vmul.f32 1.442695, %v2089_v60  ;;  %v2090_v55 = vsub.f32 %v3578_v45, %v2070_v5  ;;  %2153 = vadd.xlane.f32.xlu0 %v2152_v62 }
 0x2d3   :  { %2718 = vpow2.f32 %v2117_v32  ;;  %v2119_v7 = vmul.f32 1.442695, %v2090_v55 }
 0x2d5   :  { %v3648_v50 = vpop.eup %2714  ;;  %2720 = vpow2.f32 %v2119_v7 }
 0x2d6   :  { %v2073_v0 = vpop.xlane.xlu1 %2072  ;;  %v2155_v9 = vsel %vm2028_vm1, %v3648_v50, 0.0 }
 0x2d7   :  { %v3652_v10 = vpop.eup %2716  ;;  %v2091_v40 = vsub.f32 %v3585_v4, %v2073_v0  ;;  %2156 = vadd.xlane.f32.xlu1 %v2155_v9 }
 0x2d8   :  { %v2076_v11 = vpop.xlane.xlu0 %2075  ;;  %v2158_v16 = vsel %vm2028_vm1, %v3652_v10, 0.0 }
 0x2d9   :  { %v2121_v45 = vmul.f32 1.442695, %v2091_v40  ;;  %v2092_v22 = vsub.f32 %v3590_v6, %v2076_v11  ;;  %2159 = vadd.xlane.f32.xlu0 %v2158_v16 }
 0x2db   :  { %2722 = vpow2.f32 %v2121_v45  ;;  %v2123_v12 = vmul.f32 1.442695, %v2092_v22 }
 0x2dd   :  { %v3658_v14 = vpop.eup %2718  ;;  %2724 = vpow2.f32 %v2123_v12 }
 0x2de   :  { %v2161_v19 = vsel %vm2028_vm1, %v3658_v14, 0.0 }
 0x2df   :  { %v3662_v20 = vpop.eup %2720  ;;  %2162 = vadd.xlane.f32.xlu1 %v2161_v19 }
 0x2e0   :  { %v2164_v4 = vsel %vm2028_vm1, %v3662_v20, 0.0 }
 0x2e1   :  { %2165 = vadd.xlane.f32.xlu0 %v2164_v4 }
 0x2e5   :  { %v3666_v21 = vpop.eup %2722 }
 0x2e6   :  { %v2167_v6 = vsel %vm2028_vm1, %v3666_v21, 0.0 }
 0x2e7   :  { %v3670_v27 = vpop.eup %2724  ;;  %2168 = vadd.xlane.f32.xlu1 %v2167_v6 }
 0x2e8   :  { %v2170_v13 = vsel %vm2028_vm1, %v3670_v27, 0.0 }
 0x2e9   :  { %2171 = vadd.xlane.f32.xlu0 %v2170_v13 }
 0x33c   :  { %v2127_v42 = vpop.xlane.xlu1 %2126 }
 0x33d   :  { %2726 = vrcp.f32 %v2127_v42 }
 0x33e   :  { %v2130_v23 = vpop.xlane.xlu0 %2129 }
 0x33f   :  { %2728 = vrcp.f32 %v2130_v23 }
 0x344   :  { %v2133_v47 = vpop.xlane.xlu1 %2132 }
 0x345   :  { %2730 = vrcp.f32 %v2133_v47 }
 0x347   :  { %v2727_v24 = vpop.eup %2726 }
 0x348   :  { %v2189_v26 = vmul.f32 %v2727_v24, %v3598_v18  ;;  %v2136_v17 = vpop.xlane.xlu0 %2135 }
 0x349   :  { %v2729_v8 = vpop.eup %2728  ;;  %2732 = vrcp.f32 %v2136_v17 }
 0x34a   :  { %2205 = vst.msk [vmem:[%s3761_s7] sm:$0xff] %vm2028_vm1, %v2189_v26  ;;  %v2190_v28 = vmul.f32 %v2729_v8, %v3602_v58 }
 0x34c   :  { %2206 = vst.msk [vmem:[%s3761_s7 + $0x8] sm:$0xff] %vm2028_vm1, %v2190_v28  ;;  %v2139_v30 = vpop.xlane.xlu1 %2138 }
 0x34d   :  { %2734 = vrcp.f32 %v2139_v30 }
 0x34e   :  { %v2142_v31 = vpop.xlane.xlu0 %2141 }
 0x34f   :  { %v2731_v15 = vpop.eup %2730  ;;  %2736 = vrcp.f32 %v2142_v31 }
 0x350   :  { %v2191_v18 = vmul.f32 %v2731_v15, %v3608_v25 }
 0x352   :  { %2207 = vst.msk [vmem:[%s3761_s7 + $0x10] sm:$0xff] %vm2028_vm1, %v2191_v18 }
 0x353   :  { %v2733_v34 = vpop.eup %2732 }
 0x354   :  { %v2192_v58 = vmul.f32 %v2733_v34, %v3613_v35  ;;  %v2145_v61 = vpop.xlane.xlu1 %2144 }
 0x355   :  { %2738 = vrcp.f32 %v2145_v61 }
 0x356   :  { %2208 = vst.msk [vmem:[%s3761_s7 + $0x18] sm:$0xff] %vm2028_vm1, %v2192_v58  ;;  %v2148_v29 = vpop.xlane.xlu0 %2147 }
 0x357   :  { %v2735_v53 = vpop.eup %2734  ;;  %2740 = vrcp.f32 %v2148_v29 }
 0x358   :  { %v2193_v25 = vmul.f32 %v2735_v53, %v3618_v59 }
 0x359   :  { %v2737_v33 = vpop.eup %2736 }
 0x35a   :  { %2209 = vst.msk [vmem:[%s3761_s7 + $0x20] sm:$0xff] %vm2028_vm1, %v2193_v25  ;;  %v2194_v35 = vmul.f32 %v2737_v33, %v3622_v39 }
 0x35c   :  { %2210 = vst.msk [vmem:[%s3761_s7 + $0x28] sm:$0xff] %vm2028_vm1, %v2194_v35  ;;  %v2151_v37 = vpop.xlane.xlu1 %2150 }
 0x35d   :  { %2742 = vrcp.f32 %v2151_v37 }
 0x35e   :  { %v2154_v41 = vpop.xlane.xlu0 %2153 }
 0x35f   :  { %v2739_v43 = vpop.eup %2738  ;;  %2744 = vrcp.f32 %v2154_v41 }
 0x360   :  { %v2195_v59 = vmul.f32 %v2739_v43, %v3628_v44 }
 0x361   :  { %v2741_v36 = vpop.eup %2740 }
 0x362   :  { %2211 = vst.msk [vmem:[%s3761_s7 + $0x30] sm:$0xff] %vm2028_vm1, %v2195_v59  ;;  %v2196_v39 = vmul.f32 %v2741_v36, %v3632_v46 }
 0x364   :  { %2212 = vst.msk [vmem:[%s3761_s7 + $0x38] sm:$0xff] %vm2028_vm1, %v2196_v39  ;;  %v2157_v3 = vpop.xlane.xlu1 %2156 }
 0x365   :  { %2746 = vrcp.f32 %v2157_v3 }
 0x366   :  { %v2160_v49 = vpop.xlane.xlu0 %2159 }
 0x367   :  { %v2743_v52 = vpop.eup %2742  ;;  %2748 = vrcp.f32 %v2160_v49 }
 0x368   :  { %v2197_v44 = vmul.f32 %v2743_v52, %v3638_v57 }
 0x369   :  { %v2745_v38 = vpop.eup %2744 }
 0x36a   :  { %2213 = vst.msk [vmem:[%s3761_s7 + $0x40] sm:$0xff] %vm2028_vm1, %v2197_v44  ;;  %v2198_v46 = vmul.f32 %v2745_v38, %v3642_v1 }
 0x36c   :  { %2214 = vst.msk [vmem:[%s3761_s7 + $0x48] sm:$0xff] %vm2028_vm1, %v2198_v46  ;;  %v2163_v51 = vpop.xlane.xlu1 %2162 }
 0x36d   :  { %2750 = vrcp.f32 %v2163_v51 }
 0x36e   :  { %v2166_v2 = vpop.xlane.xlu0 %2165 }
 0x36f   :  { %v2747_v56 = vpop.eup %2746  ;;  %2752 = vrcp.f32 %v2166_v2 }
 0x370   :  { %v2199_v54 = vmul.f32 %v2747_v56, %v3648_v50 }
 0x371   :  { %v2749_v57 = vpop.eup %2748 }
 0x372   :  { %2215 = vst.msk [vmem:[%s3761_s7 + $0x50] sm:$0xff] %vm2028_vm1, %v2199_v54  ;;  %v2200_v63 = vmul.f32 %v2749_v57, %v3652_v10 }
 0x374   :  { %2216 = vst.msk [vmem:[%s3761_s7 + $0x58] sm:$0xff] %vm2028_vm1, %v2200_v63  ;;  %v2169_v48 = vpop.xlane.xlu1 %2168 }
 0x375   :  { %2754 = vrcp.f32 %v2169_v48 }
 0x376   :  { %v2172_v1 = vpop.xlane.xlu0 %2171 }
 0x377   :  { %v2751_v60 = vpop.eup %2750  ;;  %2756 = vrcp.f32 %v2172_v1 }
 0x378   :  { %v2201_v5 = vmul.f32 %v2751_v60, %v3658_v14 }
 0x379   :  { %v2753_v62 = vpop.eup %2752 }
 0x37a   :  { %2217 = vst.msk [vmem:[%s3761_s7 + $0x60] sm:$0xff] %vm2028_vm1, %v2201_v5  ;;  %v2202_v32 = vmul.f32 %v2753_v62, %v3662_v20 }
 0x37c   :  { %2218 = vst.msk [vmem:[%s3761_s7 + $0x68] sm:$0xff] %vm2028_vm1, %v2202_v32 }
 0x37f   :  { %v2755_v55 = vpop.eup %2754 }
 0x380   :  { %v2203_v7 = vmul.f32 %v2755_v55, %v3666_v21 }
 0x381   :  { %v2757_v50 = vpop.eup %2756 }
 0x382   :  { %2219 = vst.msk [vmem:[%s3761_s7 + $0x70] sm:$0xff] %vm2028_vm1, %v2203_v7  ;;  %v2204_v0 = vmul.f32 %v2757_v50, %v3670_v27 }
 0x384   :  { %2220 = vst.msk [vmem:[%s3761_s7 + $0x78] sm:$0xff] %vm2028_vm1, %v2204_v0 }

</bundles_post_ra>
